<compile_context>
chip_gen: v7x
topology: tpu7x:2x2x1
jax: 0.10.0
libtpu: 0.0.40
codegen_flags: <defaults>
</compile_context>

<pallas_src>
import jax
import jax.numpy as jnp
from jax import lax
from jax.experimental import pallas as pl
from jax.experimental.pallas import tpu as pltpu

GRAPH_IN = 1024    # graph_input_feature
GRAPH_OUT = 300    # graph_output_feature (num_heads=1 for 'gcn')
LANE = 128

# Synthetic stand-in for cvss_task_type (CVSS v3.1 base metrics -> #classes).
CVSS_TASK_TYPE = {
    "attack_vector": 4,
    "attack_complexity": 2,
    "privileges_required": 3,
    "user_interaction": 2,
    "scope": 2,
    "confidentiality": 3,
    "integrity": 3,
    "availability": 3,
}


def _gmodel_fused_kernel(adj_ref, tok1_ref, tok2_ref, tok3_ref,
                         tab1_ref, tab2_ref, tab3_ref,
                         w_ref, b_ref, wc_ref, bc_ref, out_ref):
    n = adj_ref.shape[1]
    adj = adj_ref[0]                                            # [N, N] f32

    # DGL GraphConv norm='both': D_out^-1/2 (source) / D_in^-1/2 (dest), degrees clamped >= 1.
    deg_row = jnp.sum(adj, axis=1, keepdims=True)               # out-degree  [N, 1]
    dinv_row = lax.rsqrt(jnp.maximum(deg_row, 1.0))
    deg_col = jnp.sum(adj, axis=0, keepdims=True)               # in-degree   [1, N]
    dinv_col = lax.rsqrt(jnp.maximum(deg_col, 1.0))
    # mean_nodes pulled through the GCN: a = (1/N) * colsum(A_hat)  -> [1, N]
    a_row = jnp.sum(adj * dinv_row, axis=0, keepdims=True) * dinv_col * (1.0 / n)

    # x_bar = a @ X where X = sum_streams mean_L(table[tok]).  The gather is rewritten as
    # exact one-hot token counts followed by a tiny GEMV against the (bf16) table.
    xbar = jnp.zeros((1, GRAPH_IN), jnp.float32)
    for tok_ref, tab_ref in ((tok1_ref, tab1_ref),
                             (tok2_ref, tab2_ref),
                             (tok3_ref, tab3_ref)):
        tok = tok_ref[0]                                        # [N, L] int32
        l_tok = tok.shape[1]
        v = tab_ref.shape[0]
        iota = lax.broadcasted_iota(jnp.int32, (n, v), 1)
        counts = jnp.zeros((n, v), jnp.float32)
        for l in range(l_tok):                                  # static unroll, L is small
            counts = counts + (tok[:, l:l + 1] == iota).astype(jnp.float32)
        wv = jnp.dot(a_row, counts, preferred_element_type=jnp.float32) * (1.0 / l_tok)
        xbar = xbar + jnp.dot(wv.astype(jnp.bfloat16), tab_ref[...],
                              preferred_element_type=jnp.float32)

    # hg = relu(mean_nodes(GraphConv)) = relu(xbar @ W + b)
    hg = jnp.dot(xbar.astype(jnp.bfloat16), w_ref[...],
                 preferred_element_type=jnp.float32) + b_ref[...]
    hg = jnp.maximum(hg, 0.0)

    # All per-task nn.Linear heads fused (and lane-padded) into one matmul.
    logits = jnp.dot(hg.astype(jnp.bfloat16), wc_ref[...],
                     preferred_element_type=jnp.float32) + bc_ref[...]   # [1, C_pad]
    out_ref[0] = jnp.broadcast_to(logits, (out_ref.shape[1], out_ref.shape[2]))


def gmodel_forward(adj, tokens, emb_tables, w_gcn, b_gcn, w_cls, b_cls):
    """Fused GCN + mean_nodes + relu + multi-task classifier. Returns [G, C_total] f32."""
    g_num = adj.shape[0]
    c_total = w_cls.shape[1]
    c_pad = ((c_total + LANE - 1) // LANE) * LANE

    # bf16 weight compression: halves the dominant HBM->VMEM DMAs (tables + W_gcn);
    # MXU accumulation stays f32 via preferred_element_type.
    tabs_bf = [t.astype(jnp.bfloat16) for t in emb_tables]
    w_bf = w_gcn.astype(jnp.bfloat16)
    wc_pad = jnp.zeros((w_cls.shape[0], c_pad), jnp.bfloat16)
    wc_pad = wc_pad.at[:, :c_total].set(w_cls.astype(jnp.bfloat16))
    bc_pad = jnp.zeros((1, c_pad), jnp.float32).at[:, :c_total].set(b_cls)

    def shared(arr):  # whole array resident in VMEM, same block every grid step
        nd = arr.ndim
        return pl.BlockSpec(arr.shape, lambda g, _nd=nd: (0,) * _nd)

    def per_graph(arr):  # block over the leading graph axis
        nd = arr.ndim
        return pl.BlockSpec((1,) + tuple(arr.shape[1:]),
                            lambda g, _nd=nd: (g,) + (0,) * (_nd - 1))

    out = pl.pallas_call(
        _gmodel_fused_kernel,
        out_shape=jax.ShapeDtypeStruct((g_num, 8, c_pad), jnp.float32),
        grid=(g_num,),
        in_specs=[per_graph(adj)]
        + [per_graph(t) for t in tokens]
        + [shared(t) for t in tabs_bf]
        + [shared(w_bf), shared(b_gcn), shared(wc_pad), shared(bc_pad)],
        out_specs=pl.BlockSpec((1, 8, c_pad), lambda g: (g, 0, 0)),
        compiler_params=pltpu.CompilerParams(dimension_semantics=("parallel",)),
    )(adj, *tokens, *tabs_bf, w_bf, b_gcn, wc_pad, bc_pad)

    return out[:, 0, :c_total]


def _reference(adj, tokens, emb_tables, w_gcn, b_gcn, w_cls, b_cls):
    """Pure-JAX f32 reference in the original (unfused, un-reordered) op order."""
    outs = []
    for g in range(adj.shape[0]):
        x = sum(jnp.mean(tab[tok[g]], axis=1) for tok, tab in zip(tokens, emb_tables))
        deg_r = jnp.maximum(jnp.sum(adj[g], axis=1), 1.0)
        deg_c = jnp.maximum(jnp.sum(adj[g], axis=0), 1.0)
        a_hat = adj[g] / jnp.sqrt(deg_r)[:, None] / jnp.sqrt(deg_c)[None, :]
        h = a_hat @ (x @ w_gcn) + b_gcn
        hg = jnp.maximum(jnp.mean(h, axis=0, keepdims=True), 0.0)
        outs.append(hg @ w_cls + b_cls)
    return jnp.concatenate(outs, axis=0)


if __name__ == "__main__":
    key = jax.random.PRNGKey(0)
    keys = jax.random.split(key, 10)

    G, N, L = 2, 16, 8                # graphs per batch, nodes per graph, tokens per stream
    vocab_sizes = (50, 80, 100)       # 1-gram / 2-gram / 3-gram vocab sizes

    # TODO(synk): FastTextEmbedding is not defined in the reference snippet; it is
    # approximated as mean-pooled embedding lookups per n-gram stream summed over the
    # three streams, yielding [N, 1024] node features.
    tokens = [
        jax.random.randint(keys[i], (G, N, L), 0, v, dtype=jnp.int32)
        for i, v in enumerate(vocab_sizes)
    ]
    emb_tables = [
        0.02 * jax.random.normal(keys[3 + i], (v, GRAPH_IN), dtype=jnp.float32)
        for i, v in enumerate(vocab_sizes)
    ]

    # Deterministic random symmetric adjacencies (no self loops), one per graph.
    a = jax.random.bernoulli(keys[6], 0.3, (G, N, N)).astype(jnp.float32)
    adj = jnp.maximum(a, jnp.swapaxes(a, 1, 2)) * (1.0 - jnp.eye(N, dtype=jnp.float32))

    # GraphConv(1024, 300) parameters.
    w_gcn = 0.05 * jax.random.normal(keys[7], (GRAPH_IN, GRAPH_OUT), dtype=jnp.float32)
    b_gcn = jnp.zeros((1, GRAPH_OUT), dtype=jnp.float32)

    # Multi-task classifier heads, concatenated: Linear(300, n_classes) per task.
    c_total = sum(CVSS_TASK_TYPE.values())
    w_cls = 0.05 * jax.random.normal(keys[8], (GRAPH_OUT, c_total), dtype=jnp.float32)
    b_cls = 0.01 * jax.random.normal(keys[9], (1, c_total), dtype=jnp.float32)

    logits = gmodel_forward(adj, tokens, emb_tables, w_gcn, b_gcn, w_cls, b_cls)
    logits = jax.block_until_ready(logits)

    # Sanity check against the pure-JAX f32 reference (loose tol for bf16 weights).
    ref = _reference(adj, tokens, emb_tables, w_gcn, b_gcn, w_cls, b_cls)
    max_err = float(jnp.max(jnp.abs(logits - ref)))
    assert max_err < 5e-3, f"max abs error vs reference: {max_err}"

    # Split fused logits into the per-task dict the module returns.
    ans, off = {}, 0
    for task, nc in CVSS_TASK_TYPE.items():
        ans[task] = logits[:, off:off + nc]
        off += nc
    assert off == c_total and all(v.shape == (G, CVSS_TASK_TYPE[t]) for t, v in ans.items())

    print("KERNEL_OK")
</pallas_src>

<mosaic_0001>
module attributes {stable_mosaic.version = 11 : i64} {
  func.func @_gmodel_fused_kernel(%arg0: i32, %arg1: memref<1x16x16xf32, #tpu.memory_space<vmem>>, %arg2: memref<1x16x8xi32, #tpu.memory_space<vmem>>, %arg3: memref<1x16x8xi32, #tpu.memory_space<vmem>>, %arg4: memref<1x16x8xi32, #tpu.memory_space<vmem>>, %arg5: memref<50x1024xbf16, #tpu.memory_space<vmem>>, %arg6: memref<80x1024xbf16, #tpu.memory_space<vmem>>, %arg7: memref<100x1024xbf16, #tpu.memory_space<vmem>>, %arg8: memref<1024x300xbf16, #tpu.memory_space<vmem>>, %arg9: memref<1x300xf32, #tpu.memory_space<vmem>>, %arg10: memref<300x128xbf16, #tpu.memory_space<vmem>>, %arg11: memref<1x128xf32, #tpu.memory_space<vmem>>, %arg12: memref<1x8x128xf32, #tpu.memory_space<vmem>>) attributes {dimension_semantics = [#tpu.dimension_semantics<parallel>], iteration_bounds = array<i64: 2>, scalar_prefetch = 0 : i64, scratch_operands = 0 : i64, tpu.core_type = #tpu.core_type<tc>, window_params = [{transform_indices = @transform_0, window_bounds = array<i64: 1, 16, 16>}, {transform_indices = @transform_1, window_bounds = array<i64: 1, 16, 8>}, {transform_indices = @transform_2, window_bounds = array<i64: 1, 16, 8>}, {transform_indices = @transform_3, window_bounds = array<i64: 1, 16, 8>}, {pipeline_mode = #tpu.pipeline_mode<synchronous>, transform_indices = @transform_4, window_bounds = array<i64: 50, 1024>}, {pipeline_mode = #tpu.pipeline_mode<synchronous>, transform_indices = @transform_5, window_bounds = array<i64: 80, 1024>}, {pipeline_mode = #tpu.pipeline_mode<synchronous>, transform_indices = @transform_6, window_bounds = array<i64: 100, 1024>}, {pipeline_mode = #tpu.pipeline_mode<synchronous>, transform_indices = @transform_7, window_bounds = array<i64: 1024, 300>}, {pipeline_mode = #tpu.pipeline_mode<synchronous>, transform_indices = @transform_8, window_bounds = array<i64: 1, 300>}, {pipeline_mode = #tpu.pipeline_mode<synchronous>, transform_indices = @transform_9, window_bounds = array<i64: 300, 128>}, {pipeline_mode = #tpu.pipeline_mode<synchronous>, transform_indices = @transform_10, window_bounds = array<i64: 1, 128>}, {transform_indices = @transform_11, window_bounds = array<i64: 1, 8, 128>}]} {
    %c0 = arith.constant 0 : index
    %c0_0 = arith.constant 0 : index
    %c0_1 = arith.constant 0 : index
    %0 = vector.load %arg1[%c0, %c0_0, %c0_1] : memref<1x16x16xf32, #tpu.memory_space<vmem>>, vector<1x16x16xf32>
    %1 = vector.shape_cast %0 : vector<1x16x16xf32> to vector<16x16xf32>
    %cst = arith.constant dense<0.000000e+00> : vector<16xf32>
    %2 = vector.multi_reduction <add>, %1, %cst [1] : vector<16x16xf32> to vector<16xf32>
    %3 = vector.shape_cast %2 : vector<16xf32> to vector<16x1xf32>
    %cst_2 = arith.constant 1.000000e+00 : f32
    %4 = vector.broadcast %cst_2 : f32 to vector<16x1xf32>
    %5 = arith.maximumf %3, %4 : vector<16x1xf32>
    %6 = math.rsqrt %5 : vector<16x1xf32>
    %cst_3 = arith.constant dense<0.000000e+00> : vector<16xf32>
    %7 = vector.multi_reduction <add>, %1, %cst_3 [0] : vector<16x16xf32> to vector<16xf32>
    %8 = vector.shape_cast %7 : vector<16xf32> to vector<1x16xf32>
    %cst_4 = arith.constant 1.000000e+00 : f32
    %9 = vector.broadcast %cst_4 : f32 to vector<1x16xf32>
    %10 = arith.maximumf %8, %9 : vector<1x16xf32>
    %11 = math.rsqrt %10 : vector<1x16xf32>
    %12 = vector.broadcast %6 : vector<16x1xf32> to vector<16x16xf32>
    %13 = arith.mulf %1, %12 : vector<16x16xf32>
    %cst_5 = arith.constant dense<0.000000e+00> : vector<16xf32>
    %14 = vector.multi_reduction <add>, %13, %cst_5 [0] : vector<16x16xf32> to vector<16xf32>
    %15 = vector.shape_cast %14 : vector<16xf32> to vector<1x16xf32>
    %16 = arith.mulf %15, %11 : vector<1x16xf32>
    %cst_6 = arith.constant 6.250000e-02 : f32
    %17 = vector.broadcast %cst_6 : f32 to vector<1x16xf32>
    %18 = arith.mulf %16, %17 : vector<1x16xf32>
    %cst_7 = arith.constant 0.000000e+00 : f32
    %19 = vector.broadcast %cst_7 : f32 to vector<1x1024xf32>
    %c0_8 = arith.constant 0 : index
    %c0_9 = arith.constant 0 : index
    %c0_10 = arith.constant 0 : index
    %20 = vector.load %arg2[%c0_8, %c0_9, %c0_10] : memref<1x16x8xi32, #tpu.memory_space<vmem>>, vector<1x16x8xi32>
    %21 = vector.shape_cast %20 : vector<1x16x8xi32> to vector<16x8xi32>
    %22 = tpu.iota {dimensions = array<i32: 1>} : vector<16x50xi32>
    %cst_11 = arith.constant 0.000000e+00 : f32
    %23 = vector.broadcast %cst_11 : f32 to vector<16x50xf32>
    %24 = vector.extract_strided_slice %21 {offsets = [0, 0], sizes = [16, 1], strides = [1, 1]} : vector<16x8xi32> to vector<16x1xi32>
    %25 = vector.broadcast %24 : vector<16x1xi32> to vector<16x50xi32>
    %26 = arith.cmpi eq, %25, %22 : vector<16x50xi32>
    %27 = arith.extui %26 : vector<16x50xi1> to vector<16x50xi32>
    %28 = arith.sitofp %27 : vector<16x50xi32> to vector<16x50xf32>
    %29 = arith.addf %23, %28 : vector<16x50xf32>
    %30 = vector.extract_strided_slice %21 {offsets = [0, 1], sizes = [16, 1], strides = [1, 1]} : vector<16x8xi32> to vector<16x1xi32>
    %31 = vector.broadcast %30 : vector<16x1xi32> to vector<16x50xi32>
    %32 = arith.cmpi eq, %31, %22 : vector<16x50xi32>
    %33 = arith.extui %32 : vector<16x50xi1> to vector<16x50xi32>
    %34 = arith.sitofp %33 : vector<16x50xi32> to vector<16x50xf32>
    %35 = arith.addf %29, %34 : vector<16x50xf32>
    %36 = vector.extract_strided_slice %21 {offsets = [0, 2], sizes = [16, 1], strides = [1, 1]} : vector<16x8xi32> to vector<16x1xi32>
    %37 = vector.broadcast %36 : vector<16x1xi32> to vector<16x50xi32>
    %38 = arith.cmpi eq, %37, %22 : vector<16x50xi32>
    %39 = arith.extui %38 : vector<16x50xi1> to vector<16x50xi32>
    %40 = arith.sitofp %39 : vector<16x50xi32> to vector<16x50xf32>
    %41 = arith.addf %35, %40 : vector<16x50xf32>
    %42 = vector.extract_strided_slice %21 {offsets = [0, 3], sizes = [16, 1], strides = [1, 1]} : vector<16x8xi32> to vector<16x1xi32>
    %43 = vector.broadcast %42 : vector<16x1xi32> to vector<16x50xi32>
    %44 = arith.cmpi eq, %43, %22 : vector<16x50xi32>
    %45 = arith.extui %44 : vector<16x50xi1> to vector<16x50xi32>
    %46 = arith.sitofp %45 : vector<16x50xi32> to vector<16x50xf32>
    %47 = arith.addf %41, %46 : vector<16x50xf32>
    %48 = vector.extract_strided_slice %21 {offsets = [0, 4], sizes = [16, 1], strides = [1, 1]} : vector<16x8xi32> to vector<16x1xi32>
    %49 = vector.broadcast %48 : vector<16x1xi32> to vector<16x50xi32>
    %50 = arith.cmpi eq, %49, %22 : vector<16x50xi32>
    %51 = arith.extui %50 : vector<16x50xi1> to vector<16x50xi32>
    %52 = arith.sitofp %51 : vector<16x50xi32> to vector<16x50xf32>
    %53 = arith.addf %47, %52 : vector<16x50xf32>
    %54 = vector.extract_strided_slice %21 {offsets = [0, 5], sizes = [16, 1], strides = [1, 1]} : vector<16x8xi32> to vector<16x1xi32>
    %55 = vector.broadcast %54 : vector<16x1xi32> to vector<16x50xi32>
    %56 = arith.cmpi eq, %55, %22 : vector<16x50xi32>
    %57 = arith.extui %56 : vector<16x50xi1> to vector<16x50xi32>
    %58 = arith.sitofp %57 : vector<16x50xi32> to vector<16x50xf32>
    %59 = arith.addf %53, %58 : vector<16x50xf32>
    %60 = vector.extract_strided_slice %21 {offsets = [0, 6], sizes = [16, 1], strides = [1, 1]} : vector<16x8xi32> to vector<16x1xi32>
    %61 = vector.broadcast %60 : vector<16x1xi32> to vector<16x50xi32>
    %62 = arith.cmpi eq, %61, %22 : vector<16x50xi32>
    %63 = arith.extui %62 : vector<16x50xi1> to vector<16x50xi32>
    %64 = arith.sitofp %63 : vector<16x50xi32> to vector<16x50xf32>
    %65 = arith.addf %59, %64 : vector<16x50xf32>
    %66 = vector.extract_strided_slice %21 {offsets = [0, 7], sizes = [16, 1], strides = [1, 1]} : vector<16x8xi32> to vector<16x1xi32>
    %67 = vector.broadcast %66 : vector<16x1xi32> to vector<16x50xi32>
    %68 = arith.cmpi eq, %67, %22 : vector<16x50xi32>
    %69 = arith.extui %68 : vector<16x50xi1> to vector<16x50xi32>
    %70 = arith.sitofp %69 : vector<16x50xi32> to vector<16x50xf32>
    %71 = arith.addf %65, %70 : vector<16x50xf32>
    %cst_12 = arith.constant dense<0.000000e+00> : vector<1x50xf32>
    %72 = tpu.matmul %18, %71, %cst_12 {dimension_numbers = #tpu.dot_dimension_numbers<[1], [0], [0], [1], [0, 0, 1, 1], [], []>} : vector<1x16xf32>, vector<16x50xf32>, vector<1x50xf32> -> vector<1x50xf32>
    %cst_13 = arith.constant 1.250000e-01 : f32
    %73 = vector.broadcast %cst_13 : f32 to vector<1x50xf32>
    %74 = arith.mulf %72, %73 : vector<1x50xf32>
    %75 = arith.truncf %74 : vector<1x50xf32> to vector<1x50xbf16>
    %c0_14 = arith.constant 0 : index
    %c0_15 = arith.constant 0 : index
    %76 = vector.load %arg5[%c0_14, %c0_15] : memref<50x1024xbf16, #tpu.memory_space<vmem>>, vector<50x1024xbf16>
    %cst_16 = arith.constant dense<0.000000e+00> : vector<1x1024xf32>
    %77 = tpu.matmul %75, %76, %cst_16 {dimension_numbers = #tpu.dot_dimension_numbers<[1], [0], [0], [1], [0, 0, 1, 1], [], []>} : vector<1x50xbf16>, vector<50x1024xbf16>, vector<1x1024xf32> -> vector<1x1024xf32>
    %78 = arith.addf %19, %77 : vector<1x1024xf32>
    %c0_17 = arith.constant 0 : index
    %c0_18 = arith.constant 0 : index
    %c0_19 = arith.constant 0 : index
    %79 = vector.load %arg3[%c0_17, %c0_18, %c0_19] : memref<1x16x8xi32, #tpu.memory_space<vmem>>, vector<1x16x8xi32>
    %80 = vector.shape_cast %79 : vector<1x16x8xi32> to vector<16x8xi32>
    %81 = tpu.iota {dimensions = array<i32: 1>} : vector<16x80xi32>
    %cst_20 = arith.constant 0.000000e+00 : f32
    %82 = vector.broadcast %cst_20 : f32 to vector<16x80xf32>
    %83 = vector.extract_strided_slice %80 {offsets = [0, 0], sizes = [16, 1], strides = [1, 1]} : vector<16x8xi32> to vector<16x1xi32>
    %84 = vector.broadcast %83 : vector<16x1xi32> to vector<16x80xi32>
    %85 = arith.cmpi eq, %84, %81 : vector<16x80xi32>
    %86 = arith.extui %85 : vector<16x80xi1> to vector<16x80xi32>
    %87 = arith.sitofp %86 : vector<16x80xi32> to vector<16x80xf32>
    %88 = arith.addf %82, %87 : vector<16x80xf32>
    %89 = vector.extract_strided_slice %80 {offsets = [0, 1], sizes = [16, 1], strides = [1, 1]} : vector<16x8xi32> to vector<16x1xi32>
    %90 = vector.broadcast %89 : vector<16x1xi32> to vector<16x80xi32>
    %91 = arith.cmpi eq, %90, %81 : vector<16x80xi32>
    %92 = arith.extui %91 : vector<16x80xi1> to vector<16x80xi32>
    %93 = arith.sitofp %92 : vector<16x80xi32> to vector<16x80xf32>
    %94 = arith.addf %88, %93 : vector<16x80xf32>
    %95 = vector.extract_strided_slice %80 {offsets = [0, 2], sizes = [16, 1], strides = [1, 1]} : vector<16x8xi32> to vector<16x1xi32>
    %96 = vector.broadcast %95 : vector<16x1xi32> to vector<16x80xi32>
    %97 = arith.cmpi eq, %96, %81 : vector<16x80xi32>
    %98 = arith.extui %97 : vector<16x80xi1> to vector<16x80xi32>
    %99 = arith.sitofp %98 : vector<16x80xi32> to vector<16x80xf32>
    %100 = arith.addf %94, %99 : vector<16x80xf32>
    %101 = vector.extract_strided_slice %80 {offsets = [0, 3], sizes = [16, 1], strides = [1, 1]} : vector<16x8xi32> to vector<16x1xi32>
    %102 = vector.broadcast %101 : vector<16x1xi32> to vector<16x80xi32>
    %103 = arith.cmpi eq, %102, %81 : vector<16x80xi32>
    %104 = arith.extui %103 : vector<16x80xi1> to vector<16x80xi32>
    %105 = arith.sitofp %104 : vector<16x80xi32> to vector<16x80xf32>
    %106 = arith.addf %100, %105 : vector<16x80xf32>
    %107 = vector.extract_strided_slice %80 {offsets = [0, 4], sizes = [16, 1], strides = [1, 1]} : vector<16x8xi32> to vector<16x1xi32>
    %108 = vector.broadcast %107 : vector<16x1xi32> to vector<16x80xi32>
    %109 = arith.cmpi eq, %108, %81 : vector<16x80xi32>
    %110 = arith.extui %109 : vector<16x80xi1> to vector<16x80xi32>
    %111 = arith.sitofp %110 : vector<16x80xi32> to vector<16x80xf32>
    %112 = arith.addf %106, %111 : vector<16x80xf32>
    %113 = vector.extract_strided_slice %80 {offsets = [0, 5], sizes = [16, 1], strides = [1, 1]} : vector<16x8xi32> to vector<16x1xi32>
    %114 = vector.broadcast %113 : vector<16x1xi32> to vector<16x80xi32>
    %115 = arith.cmpi eq, %114, %81 : vector<16x80xi32>
    %116 = arith.extui %115 : vector<16x80xi1> to vector<16x80xi32>
    %117 = arith.sitofp %116 : vector<16x80xi32> to vector<16x80xf32>
    %118 = arith.addf %112, %117 : vector<16x80xf32>
    %119 = vector.extract_strided_slice %80 {offsets = [0, 6], sizes = [16, 1], strides = [1, 1]} : vector<16x8xi32> to vector<16x1xi32>
    %120 = vector.broadcast %119 : vector<16x1xi32> to vector<16x80xi32>
    %121 = arith.cmpi eq, %120, %81 : vector<16x80xi32>
    %122 = arith.extui %121 : vector<16x80xi1> to vector<16x80xi32>
    %123 = arith.sitofp %122 : vector<16x80xi32> to vector<16x80xf32>
    %124 = arith.addf %118, %123 : vector<16x80xf32>
    %125 = vector.extract_strided_slice %80 {offsets = [0, 7], sizes = [16, 1], strides = [1, 1]} : vector<16x8xi32> to vector<16x1xi32>
    %126 = vector.broadcast %125 : vector<16x1xi32> to vector<16x80xi32>
    %127 = arith.cmpi eq, %126, %81 : vector<16x80xi32>
    %128 = arith.extui %127 : vector<16x80xi1> to vector<16x80xi32>
    %129 = arith.sitofp %128 : vector<16x80xi32> to vector<16x80xf32>
    %130 = arith.addf %124, %129 : vector<16x80xf32>
    %cst_21 = arith.constant dense<0.000000e+00> : vector<1x80xf32>
    %131 = tpu.matmul %18, %130, %cst_21 {dimension_numbers = #tpu.dot_dimension_numbers<[1], [0], [0], [1], [0, 0, 1, 1], [], []>} : vector<1x16xf32>, vector<16x80xf32>, vector<1x80xf32> -> vector<1x80xf32>
    %cst_22 = arith.constant 1.250000e-01 : f32
    %132 = vector.broadcast %cst_22 : f32 to vector<1x80xf32>
    %133 = arith.mulf %131, %132 : vector<1x80xf32>
    %134 = arith.truncf %133 : vector<1x80xf32> to vector<1x80xbf16>
    %c0_23 = arith.constant 0 : index
    %c0_24 = arith.constant 0 : index
    %135 = vector.load %arg6[%c0_23, %c0_24] : memref<80x1024xbf16, #tpu.memory_space<vmem>>, vector<80x1024xbf16>
    %cst_25 = arith.constant dense<0.000000e+00> : vector<1x1024xf32>
    %136 = tpu.matmul %134, %135, %cst_25 {dimension_numbers = #tpu.dot_dimension_numbers<[1], [0], [0], [1], [0, 0, 1, 1], [], []>} : vector<1x80xbf16>, vector<80x1024xbf16>, vector<1x1024xf32> -> vector<1x1024xf32>
    %137 = arith.addf %78, %136 : vector<1x1024xf32>
    %c0_26 = arith.constant 0 : index
    %c0_27 = arith.constant 0 : index
    %c0_28 = arith.constant 0 : index
    %138 = vector.load %arg4[%c0_26, %c0_27, %c0_28] : memref<1x16x8xi32, #tpu.memory_space<vmem>>, vector<1x16x8xi32>
    %139 = vector.shape_cast %138 : vector<1x16x8xi32> to vector<16x8xi32>
    %140 = tpu.iota {dimensions = array<i32: 1>} : vector<16x100xi32>
    %cst_29 = arith.constant 0.000000e+00 : f32
    %141 = vector.broadcast %cst_29 : f32 to vector<16x100xf32>
    %142 = vector.extract_strided_slice %139 {offsets = [0, 0], sizes = [16, 1], strides = [1, 1]} : vector<16x8xi32> to vector<16x1xi32>
    %143 = vector.broadcast %142 : vector<16x1xi32> to vector<16x100xi32>
    %144 = arith.cmpi eq, %143, %140 : vector<16x100xi32>
    %145 = arith.extui %144 : vector<16x100xi1> to vector<16x100xi32>
    %146 = arith.sitofp %145 : vector<16x100xi32> to vector<16x100xf32>
    %147 = arith.addf %141, %146 : vector<16x100xf32>
    %148 = vector.extract_strided_slice %139 {offsets = [0, 1], sizes = [16, 1], strides = [1, 1]} : vector<16x8xi32> to vector<16x1xi32>
    %149 = vector.broadcast %148 : vector<16x1xi32> to vector<16x100xi32>
    %150 = arith.cmpi eq, %149, %140 : vector<16x100xi32>
    %151 = arith.extui %150 : vector<16x100xi1> to vector<16x100xi32>
    %152 = arith.sitofp %151 : vector<16x100xi32> to vector<16x100xf32>
    %153 = arith.addf %147, %152 : vector<16x100xf32>
    %154 = vector.extract_strided_slice %139 {offsets = [0, 2], sizes = [16, 1], strides = [1, 1]} : vector<16x8xi32> to vector<16x1xi32>
    %155 = vector.broadcast %154 : vector<16x1xi32> to vector<16x100xi32>
    %156 = arith.cmpi eq, %155, %140 : vector<16x100xi32>
    %157 = arith.extui %156 : vector<16x100xi1> to vector<16x100xi32>
    %158 = arith.sitofp %157 : vector<16x100xi32> to vector<16x100xf32>
    %159 = arith.addf %153, %158 : vector<16x100xf32>
    %160 = vector.extract_strided_slice %139 {offsets = [0, 3], sizes = [16, 1], strides = [1, 1]} : vector<16x8xi32> to vector<16x1xi32>
    %161 = vector.broadcast %160 : vector<16x1xi32> to vector<16x100xi32>
    %162 = arith.cmpi eq, %161, %140 : vector<16x100xi32>
    %163 = arith.extui %162 : vector<16x100xi1> to vector<16x100xi32>
    %164 = arith.sitofp %163 : vector<16x100xi32> to vector<16x100xf32>
    %165 = arith.addf %159, %164 : vector<16x100xf32>
    %166 = vector.extract_strided_slice %139 {offsets = [0, 4], sizes = [16, 1], strides = [1, 1]} : vector<16x8xi32> to vector<16x1xi32>
    %167 = vector.broadcast %166 : vector<16x1xi32> to vector<16x100xi32>
    %168 = arith.cmpi eq, %167, %140 : vector<16x100xi32>
    %169 = arith.extui %168 : vector<16x100xi1> to vector<16x100xi32>
    %170 = arith.sitofp %169 : vector<16x100xi32> to vector<16x100xf32>
    %171 = arith.addf %165, %170 : vector<16x100xf32>
    %172 = vector.extract_strided_slice %139 {offsets = [0, 5], sizes = [16, 1], strides = [1, 1]} : vector<16x8xi32> to vector<16x1xi32>
    %173 = vector.broadcast %172 : vector<16x1xi32> to vector<16x100xi32>
    %174 = arith.cmpi eq, %173, %140 : vector<16x100xi32>
    %175 = arith.extui %174 : vector<16x100xi1> to vector<16x100xi32>
    %176 = arith.sitofp %175 : vector<16x100xi32> to vector<16x100xf32>
    %177 = arith.addf %171, %176 : vector<16x100xf32>
    %178 = vector.extract_strided_slice %139 {offsets = [0, 6], sizes = [16, 1], strides = [1, 1]} : vector<16x8xi32> to vector<16x1xi32>
    %179 = vector.broadcast %178 : vector<16x1xi32> to vector<16x100xi32>
    %180 = arith.cmpi eq, %179, %140 : vector<16x100xi32>
    %181 = arith.extui %180 : vector<16x100xi1> to vector<16x100xi32>
    %182 = arith.sitofp %181 : vector<16x100xi32> to vector<16x100xf32>
    %183 = arith.addf %177, %182 : vector<16x100xf32>
    %184 = vector.extract_strided_slice %139 {offsets = [0, 7], sizes = [16, 1], strides = [1, 1]} : vector<16x8xi32> to vector<16x1xi32>
    %185 = vector.broadcast %184 : vector<16x1xi32> to vector<16x100xi32>
    %186 = arith.cmpi eq, %185, %140 : vector<16x100xi32>
    %187 = arith.extui %186 : vector<16x100xi1> to vector<16x100xi32>
    %188 = arith.sitofp %187 : vector<16x100xi32> to vector<16x100xf32>
    %189 = arith.addf %183, %188 : vector<16x100xf32>
    %cst_30 = arith.constant dense<0.000000e+00> : vector<1x100xf32>
    %190 = tpu.matmul %18, %189, %cst_30 {dimension_numbers = #tpu.dot_dimension_numbers<[1], [0], [0], [1], [0, 0, 1, 1], [], []>} : vector<1x16xf32>, vector<16x100xf32>, vector<1x100xf32> -> vector<1x100xf32>
    %cst_31 = arith.constant 1.250000e-01 : f32
    %191 = vector.broadcast %cst_31 : f32 to vector<1x100xf32>
    %192 = arith.mulf %190, %191 : vector<1x100xf32>
    %193 = arith.truncf %192 : vector<1x100xf32> to vector<1x100xbf16>
    %c0_32 = arith.constant 0 : index
    %c0_33 = arith.constant 0 : index
    %194 = vector.load %arg7[%c0_32, %c0_33] : memref<100x1024xbf16, #tpu.memory_space<vmem>>, vector<100x1024xbf16>
    %cst_34 = arith.constant dense<0.000000e+00> : vector<1x1024xf32>
    %195 = tpu.matmul %193, %194, %cst_34 {dimension_numbers = #tpu.dot_dimension_numbers<[1], [0], [0], [1], [0, 0, 1, 1], [], []>} : vector<1x100xbf16>, vector<100x1024xbf16>, vector<1x1024xf32> -> vector<1x1024xf32>
    %196 = arith.addf %137, %195 : vector<1x1024xf32>
    %197 = arith.truncf %196 : vector<1x1024xf32> to vector<1x1024xbf16>
    %c0_35 = arith.constant 0 : index
    %c0_36 = arith.constant 0 : index
    %198 = vector.load %arg8[%c0_35, %c0_36] : memref<1024x300xbf16, #tpu.memory_space<vmem>>, vector<1024x300xbf16>
    %cst_37 = arith.constant dense<0.000000e+00> : vector<1x300xf32>
    %199 = tpu.matmul %197, %198, %cst_37 {dimension_numbers = #tpu.dot_dimension_numbers<[1], [0], [0], [1], [0, 0, 1, 1], [], []>} : vector<1x1024xbf16>, vector<1024x300xbf16>, vector<1x300xf32> -> vector<1x300xf32>
    %c0_38 = arith.constant 0 : index
    %c0_39 = arith.constant 0 : index
    %200 = vector.load %arg9[%c0_38, %c0_39] : memref<1x300xf32, #tpu.memory_space<vmem>>, vector<1x300xf32>
    %201 = arith.addf %199, %200 : vector<1x300xf32>
    %cst_40 = arith.constant 0.000000e+00 : f32
    %202 = vector.broadcast %cst_40 : f32 to vector<1x300xf32>
    %203 = arith.maximumf %201, %202 : vector<1x300xf32>
    %204 = arith.truncf %203 : vector<1x300xf32> to vector<1x300xbf16>
    %c0_41 = arith.constant 0 : index
    %c0_42 = arith.constant 0 : index
    %205 = vector.load %arg10[%c0_41, %c0_42] : memref<300x128xbf16, #tpu.memory_space<vmem>>, vector<300x128xbf16>
    %cst_43 = arith.constant dense<0.000000e+00> : vector<1x128xf32>
    %206 = tpu.matmul %204, %205, %cst_43 {dimension_numbers = #tpu.dot_dimension_numbers<[1], [0], [0], [1], [0, 0, 1, 1], [], []>} : vector<1x300xbf16>, vector<300x128xbf16>, vector<1x128xf32> -> vector<1x128xf32>
    %c0_44 = arith.constant 0 : index
    %c0_45 = arith.constant 0 : index
    %207 = vector.load %arg11[%c0_44, %c0_45] : memref<1x128xf32, #tpu.memory_space<vmem>>, vector<1x128xf32>
    %208 = arith.addf %206, %207 : vector<1x128xf32>
    %209 = vector.shape_cast %208 : vector<1x128xf32> to vector<1x128xf32>
    %210 = vector.broadcast %209 : vector<1x128xf32> to vector<8x128xf32>
    %c0_46 = arith.constant 0 : index
    %c0_47 = arith.constant 0 : index
    %c0_48 = arith.constant 0 : index
    %211 = vector.load %arg12[%c0_46, %c0_47, %c0_48] : memref<1x8x128xf32, #tpu.memory_space<vmem>>, vector<1x8x128xf32>
    %212 = vector.shape_cast %211 : vector<1x8x128xf32> to vector<8x128xf32>
    %213 = vector.shape_cast %210 : vector<8x128xf32> to vector<1x8x128xf32>
    tpu.vector_store %arg12[%c0_46, %c0_47, %c0_48], %213 {strides = array<i32>} : memref<1x8x128xf32, #tpu.memory_space<vmem>>, vector<1x8x128xf32>,
    return
  }
  func.func @transform_0(%arg0: i32) -> (i32, i32, i32) {
    %c0_i32 = arith.constant 0 : i32
    %c0_i32_0 = arith.constant 0 : i32
    %c0_i32_1 = arith.constant 0 : i32
    return %arg0, %c0_i32, %c0_i32_0 : i32, i32, i32
  }
  func.func @transform_1(%arg0: i32) -> (i32, i32, i32) {
    %c0_i32 = arith.constant 0 : i32
    %c0_i32_0 = arith.constant 0 : i32
    %c0_i32_1 = arith.constant 0 : i32
    return %arg0, %c0_i32, %c0_i32_0 : i32, i32, i32
  }
  func.func @transform_2(%arg0: i32) -> (i32, i32, i32) {
    %c0_i32 = arith.constant 0 : i32
    %c0_i32_0 = arith.constant 0 : i32
    %c0_i32_1 = arith.constant 0 : i32
    return %arg0, %c0_i32, %c0_i32_0 : i32, i32, i32
  }
  func.func @transform_3(%arg0: i32) -> (i32, i32, i32) {
    %c0_i32 = arith.constant 0 : i32
    %c0_i32_0 = arith.constant 0 : i32
    %c0_i32_1 = arith.constant 0 : i32
    return %arg0, %c0_i32, %c0_i32_0 : i32, i32, i32
  }
  func.func @transform_4(%arg0: i32) -> (i32, i32) {
    %c0_i32 = arith.constant 0 : i32
    %c0_i32_0 = arith.constant 0 : i32
    %c0_i32_1 = arith.constant 0 : i32
    return %c0_i32, %c0_i32_0 : i32, i32
  }
  func.func @transform_5(%arg0: i32) -> (i32, i32) {
    %c0_i32 = arith.constant 0 : i32
    %c0_i32_0 = arith.constant 0 : i32
    %c0_i32_1 = arith.constant 0 : i32
    return %c0_i32, %c0_i32_0 : i32, i32
  }
  func.func @transform_6(%arg0: i32) -> (i32, i32) {
    %c0_i32 = arith.constant 0 : i32
    %c0_i32_0 = arith.constant 0 : i32
    %c0_i32_1 = arith.constant 0 : i32
    return %c0_i32, %c0_i32_0 : i32, i32
  }
  func.func @transform_7(%arg0: i32) -> (i32, i32) {
    %c0_i32 = arith.constant 0 : i32
    %c0_i32_0 = arith.constant 0 : i32
    %c0_i32_1 = arith.constant 0 : i32
    return %c0_i32, %c0_i32_0 : i32, i32
  }
  func.func @transform_8(%arg0: i32) -> (i32, i32) {
    %c0_i32 = arith.constant 0 : i32
    %c0_i32_0 = arith.constant 0 : i32
    %c0_i32_1 = arith.constant 0 : i32
    return %c0_i32, %c0_i32_0 : i32, i32
  }
  func.func @transform_9(%arg0: i32) -> (i32, i32) {
    %c0_i32 = arith.constant 0 : i32
    %c0_i32_0 = arith.constant 0 : i32
    %c0_i32_1 = arith.constant 0 : i32
    return %c0_i32, %c0_i32_0 : i32, i32
  }
  func.func @transform_10(%arg0: i32) -> (i32, i32) {
    %c0_i32 = arith.constant 0 : i32
    %c0_i32_0 = arith.constant 0 : i32
    %c0_i32_1 = arith.constant 0 : i32
    return %c0_i32, %c0_i32_0 : i32, i32
  }
  func.func @transform_11(%arg0: i32) -> (i32, i32, i32) {
    %c0_i32 = arith.constant 0 : i32
    %c0_i32_0 = arith.constant 0 : i32
    %c0_i32_1 = arith.constant 0 : i32
    return %arg0, %c0_i32, %c0_i32_0 : i32, i32, i32
  }
}

</mosaic_0001>

<bundles_post_ra>
// kernel: tpu_custom_call.1
= control target key start
LH: loop header
LB: loop body
LE: loop exit
PB: predicated region body
PF: predicated region fallthrough
CT: control target
= control target key end

     0   :  { %s6958_s0 = inlined_call_operand.vmem [shape: f32[2,16,16], index: 0, kind: input, shape index: {}]   ;;  %s6959_s1 = inlined_call_operand.vmem [shape: s32[2,16,8], index: 1, kind: input, shape index: {}]   ;;  %s6960_s2 = inlined_call_operand.vmem [shape: s32[2,16,8], index: 2, kind: input, shape index: {}]   ;;  %s6961_s3 = inlined_call_operand.vmem [shape: s32[2,16,8], index: 3, kind: input, shape index: {}]   ;;  %s6962_s4 = inlined_call_operand.vmem [shape: bf16[50,1024], index: 4, kind: input, shape index: {}]   ;;  %s6963_s5 = inlined_call_operand.vmem [shape: bf16[80,1024], index: 5, kind: input, shape index: {}]   ;;  %s6964_s6 = inlined_call_operand.vmem [shape: bf16[100,1024], index: 6, kind: input, shape index: {}]   ;;  %s6965_s7 = inlined_call_operand.vmem [shape: bf16[1024,300], index: 7, kind: input, shape index: {}]   ;;  %s6966_s8 = inlined_call_operand.vmem [shape: f32[1,300], index: 8, kind: input, shape index: {}]   ;;  %s6967_s9 = inlined_call_operand.vmem [shape: bf16[300,128], index: 9, kind: input, shape index: {}]   ;;  %s6968_s10 = inlined_call_operand.vmem [shape: f32[1,128], index: 10, kind: input, shape index: {}]   ;;  %s6969_s11 = inlined_call_operand.hbm [shape: f32[2,8,128], index: 11, kind: output, shape index: {}]  }
   0x1   :  { %6970 = sst [smem:[#allocation5_spill]] %s6958_s0 }
   0x2   :  { %16 = vsyncpa [#allocation3], 0 }
   0x3   :  { %18 = vsyncpa [#allocation3 + $0x1], 0  ;;  %s5472_s17 = smov 0   ;;  %s5474_s18 = smov 0  }
   0x4   :  { %s5476_s19 = smov 0   ;;  %s5478_s20 = smov 0  }
   0x5 LB: > { %s5493_s21 = sadd.s32 4294967295, %s5398_s20   ;;  %s4315_s22 = sadd.s32 4294967294, %s5398_s20   ;;  %s5398_s20 = sphi %s5478_s20, %s6977_s20   ;;  %s5394_s19 = sphi %s5476_s19, %s6976_s19   ;;  %s5390_s18 = sphi %s5474_s18, %s6975_s18   ;;  %s5386_s17 = sphi %s5472_s17, %s6974_s17  }
   0x6   : > { %s5497_s23 = sadd.s32 1, %s5398_s20   ;;  %s282_s24 = sadd.s32 1, %s5394_s19 }
   0x7   : > { %s279_s25 = ssub.s32 %s5398_s20, %s5497_s23  ;;  %p292_p0 = scmp.ne.s32.totalorder %s5394_s19, %s5390_s18 }
   0x8   : > { %p280_p1 = scmp.eq.s32.totalorder %s279_s25, 0  ;;  %p293_p2 = scmp.eq.s32.totalorder %s5493_s21, 1 }
   0x9   : > { %p298_p3 = scmp.ne.s32.totalorder %s5390_s18, %s5386_s17  ;;  %p299_p4 = scmp.eq.s32.totalorder %s4315_s22, 1 }
   0xa   : > { %s5508_s26 = scalar_select %p280_p1, %s5394_s19, %s282_s24  }
   0xb   : > { %p5510_p5 = por %p293_p2, %p292_p0  ;;  %p5514_p6 = por %p299_p4, %p298_p3 }
   0xc   : > { %p4318_p7 = scmp.ge.s32.totalorder %s5398_s20, 1  ;;  %p370_p8 = scmp.lt.s32.totalorder %s5398_s20, 3 }
   0xe   : > { %p371_p9 = pnand %p4318_p7, %p370_p8 }
   0xf   : > { %p425_p10 = scmp.lt.s32.totalorder (!%p371_p9), %s5493_s21, 1  ;;  %v5400_v0 = vmov (!%p371_p9), 0   ;;  %v5401_v1 = vmov (!%p371_p9), 1   ;;  %vm448_vm0 = vcmask (!%p371_p9), 130048   ;;  %s6973_s0 = sld [smem:[#allocation5_spill]] (!%p371_p9)  ;;  %v5402_v9 = vmov (!%p371_p9), 2  }
  0x10   : > { %374 = sbr.rel (%p371_p9) target bundleno = 1638 (0x666), region = 64  ;;  %5004 = vset.pattern.permute.xlu1 (!%p371_p9), %v5400_v0  ;;  %5005 = vset.pattern.permute.xlu0 (!%p371_p9), %v5401_v1  ;;  %v5403_v10 = vmov (!%p371_p9), 3   ;;  %v5404_v13 = vmov (!%p371_p9), 4   ;;  %v5405_v14 = vmov (!%p371_p9), 5   ;;  %v5406_v15 = vmov (!%p371_p9), 6   ;;  %s422_s24 = sand.u32 (!%p371_p9), 1, %s5390_s18  }
  0x11   : > { %1203 = vmatprep.mubr.bf16.mxu1 (!%p371_p9), %v5400_v0  ;;  %v5407_v16 = vmov (!%p371_p9), 7   ;;  %v5408_v17 = vmov (!%p371_p9), 0.0|0.0   ;;  %vm5409_vm1 = vmmov (!%p371_p9), 0   ;;  %v5410_v18 = vmov (!%p371_p9), 0.0   ;;  %s4319_s25 = sshll.u32 (!%p371_p9), %s422_s24, 3  ;;  %s4740_s13 = sshll.u32 (!%p371_p9), %s5493_s21, 7 }
  0x12   : > { %4901 = vmatprep.subr.bf16.mxu0 (!%p371_p9), %v5408_v17  ;;  %4874 = vmatprep.mubr.msk.f32.mxu0 (!%p371_p9), %vm5409_vm1, %v5410_v18  ;;  %v483_v49 = vlaneseq (!%p371_p9) }
  0x14   : > { %v5620_v55 = vand.u32 (!%p371_p9), 127, %v483_v49 }
  0x17   : > { %s426_s29 = scalar_select %p425_p10, %s5493_s21, 1 }
  0x19   : > { %s5525_s30 = sshll.u32 %s426_s29, 4 }
  0x1a   : > { %s434_s14 = scalar_lea.vmem %s6959_s1, %s5525_s30  ;;  %s429_s22 = scalar_lea.vmem %s6973_s0, %s5525_s30 }
  0x1b   : > { %v481_v2 = vld [vmem:[%s434_s14] sm:$0xff]  ;;  %v482_v5 = vld [vmem:[%s434_s14 + $0x8] sm:$0xff]  ;;  %s439_s29 = scalar_lea.vmem %s6960_s2, %s5525_s30  ;;  %s444_s14 = scalar_lea.vmem %s6961_s3, %s5525_s30 }
  0x1c   : > { %v5535_v3 = vld [vmem:[%s429_s22] sm:$0xff]  ;;  %486 = vperm.xlu1 %5004, %v481_v2   ;;  %v5539_v6 = vld [vmem:[%s429_s22 + $0x8] sm:$0xff]  ;;  %s6916_s22 = scalar_lea.hbm %s6969_s11, %s4740_s13 }
  0x1d   : > { %v449_v4 = vsel %vm448_vm0, %v5535_v3, 0.0  ;;  %v452_v7 = vsel %vm448_vm0, %v5539_v6, 0.0  ;;  %v700_v11 = vld [vmem:[%s439_s29] sm:$0xff]  ;;  %v701_v12 = vld [vmem:[%s439_s29 + $0x8] sm:$0xff]  ;;  %s4207_s29 = scalar_lea.sflag [#allocation3], %s422_s24 }
  0x1e   : > { %450 = vadd.xlane.f32.xlu0 %v449_v4  ;;  %v5543_v8 = vadd.f32 %v452_v7, %v449_v4  ;;  %v1628_v19 = vld [vmem:[%s444_s14 + $0x8] sm:$0xff]  ;;  %v1627_v20 = vld [vmem:[%s444_s14] sm:$0xff]  ;;  %s424_s14 = scalar_lea.vmem [#allocation2], %s4319_s25  ;;  %s5411_s25 = smov [#allocation2]  }
  0x1f   : > { %s4220_s30 = sshll.u32 %s424_s14, 4  ;;  %s5340_s12 = sshll.u32 %s5411_s25, 4  ;;  %s6918_s30 = int_to_ptr.vmem [resolvable:$true] %s4220_s30  ;;  %s5341_s12 = int_to_ptr.vmem [resolvable:$false] %s5340_s12 }
  0x20   : > { %489 = vperm.xlu1 %5004, %v482_v5   ;;  %v460_v38 = vrot.slane %v5543_v8, 4  ;;  %s5336_s21 = scalar_lea.vmem %s6918_s30, 128  ;;  %s5342_s0 = scalar_lea.vmem %s5341_s12, 256 }
  0x21   : > { %p5337_p11 = scmp.ne.s32.totalorder %s6918_s30, %s5336_s21  ;;  %p5343_p0 = scmp.lt.s32.totalorder %s6918_s30, %s5341_s12 }
  0x22   : > { %453 = vadd.xlane.f32.xlu0 %v452_v7  ;;  %v461_v41 = vadd.f32 %v460_v38, %v5543_v8  ;;  %p5344_p1 = scmp.lt.s32.totalorder %s5342_s0, %s5336_s21 }
  0x23   : > { %p5338_p12 = pnand %p5337_p11, %p5510_p5 }
  0x24   : > { %5006 = vset.pattern.permute.xlu1 %v5401_v1  ;;  %v462_v46 = vrot.slane %v461_v41, 2  ;;  %p5345_p2 = por %p5344_p1, %p5343_p0 }
  0x25   : > { %503 = vperm.xlu1 %5006, %v482_v5   ;;  %p5339_p13 = pneg %p5338_p12 }
  0x26   : > { %v463_v52 = vadd.f32 %v462_v46, %v461_v41 }
  0x27   : > { %p5346_p3 = pnand %p5345_p2, %p5339_p13 }
  0x28   : > { %v464_v57 = vrot.slane %v463_v52, 1 }
  0x29   : > { %5007 = vset.pattern.permute.xlu1 %v5402_v9 }
  0x2a   : > { %514 = vperm.xlu1 %5007, %v481_v2   ;;  %v465_v62 = vadd.f32 %v464_v57, %v463_v52 }
  0x2e   : > { %517 = vperm.xlu1 %5007, %v482_v5  }
  0x32   : > { %5008 = vset.pattern.permute.xlu1 %v5403_v10 }
  0x33   : > { %528 = vperm.xlu1 %5008, %v481_v2  }
  0x37   : > { %531 = vperm.xlu1 %5008, %v482_v5  }
  0x38   : > { %500 = vperm.xlu0 %5005, %v481_v2  }
  0x3b   : > { %5009 = vset.pattern.permute.xlu1 %v5400_v0 }
  0x3c   : > { %5012 = vset.pattern.permute.xlu0 %v5402_v9  ;;  %703 = vperm.xlu1 %5009, %v700_v11  }
  0x3d   : > { %731 = vperm.xlu0 %5012, %v700_v11  }
  0x40   : > { %706 = vperm.xlu1 %5009, %v701_v12  }
  0x41   : > { %5018 = vset.pattern.permute.xlu0 %v5404_v13 }
  0x42   : > { %762 = vperm.xlu0 %5018, %v701_v12  }
  0x44   : > { %5010 = vset.pattern.permute.xlu1 %v5401_v1 }
  0x45   : > { %717 = vperm.xlu1 %5010, %v700_v11  }
  0x46   : > { %5019 = vset.pattern.permute.xlu0 %v5405_v14 }
  0x47   : > { %559 = vperm.xlu0 %5019, %v482_v5  }
  0x49   : > { %720 = vperm.xlu1 %5010, %v701_v12  }
  0x4b   : > { %773 = vperm.xlu0 %5019, %v700_v11  }
  0x4d   : > { %5011 = vset.pattern.permute.xlu1 %v5404_v13 }
  0x4e   : > { %542 = vperm.xlu1 %5011, %v481_v2  }
  0x4f   : > { %5021 = vset.pattern.permute.xlu0 %v5406_v15 }
  0x50   : > { %570 = vperm.xlu0 %5021, %v481_v2  }
  0x52   : > { %545 = vperm.xlu1 %5011, %v482_v5  }
  0x54   : > { %790 = vperm.xlu0 %5021, %v701_v12  }
  0x56   : > { %5013 = vset.pattern.permute.xlu1 %v5402_v9 }
  0x57   : > { %734 = vperm.xlu1 %5013, %v701_v12  }
  0x58   : > { %5025 = vset.pattern.permute.xlu0 %v5400_v0 }
  0x59   : > { %1630 = vperm.xlu0 %5025, %v1627_v20  }
  0x5b   : > { %5014 = vset.pattern.permute.xlu1 %v5405_v14 }
  0x5c   : > { %556 = vperm.xlu1 %5014, %v481_v2  }
  0x5d   : > { %5028 = vset.pattern.permute.xlu0 %v5401_v1 }
  0x5e   : > { %1647 = vperm.xlu0 %5028, %v1628_v19  }
  0x60   : > { %5015 = vset.pattern.permute.xlu1 %v5403_v10 }
  0x61   : > { %745 = vperm.xlu1 %5015, %v700_v11  }
  0x62   : > { %5030 = vset.pattern.permute.xlu0 %v5403_v10 }
  0x63   : > { %1672 = vperm.xlu0 %5030, %v1627_v20  }
  0x65   : > { %748 = vperm.xlu1 %5015, %v701_v12  }
  0x67   : > { %5033 = vset.pattern.permute.xlu0 %v5404_v13 }
  0x68   : > { %1689 = vperm.xlu0 %5033, %v1628_v19  }
  0x69   : > { %5016 = vset.pattern.permute.xlu1 %v5406_v15 }
  0x6a   : > { %573 = vperm.xlu1 %5016, %v482_v5  }
  0x6c   : > { %5035 = vset.pattern.permute.xlu0 %v5406_v15 }
  0x6d   : > { %1714 = vperm.xlu0 %5035, %v1627_v20  }
  0x6e   : > { %5017 = vset.pattern.permute.xlu1 %v5404_v13 }
  0x6f   : > { %759 = vperm.xlu1 %5017, %v700_v11  }
  0x71   : > { %5038 = vset.pattern.permute.xlu0 %v5407_v16 }
  0x72   : > { %1731 = vperm.xlu0 %5038, %v1628_v19  }
  0x73   : > { %5020 = vset.pattern.permute.xlu1 %v5407_v16 }
  0x74   : > { %584 = vperm.xlu1 %5020, %v481_v2  }
  0x78   : > { %587 = vperm.xlu1 %5020, %v482_v5  }
  0x7c   : > { %5022 = vset.pattern.permute.xlu1 %v5405_v14 }
  0x7d   : > { %776 = vperm.xlu1 %5022, %v701_v12  }
  0x81   : > { %5023 = vset.pattern.permute.xlu1 %v5406_v15 }
  0x82   : > { %787 = vperm.xlu1 %5023, %v700_v11  }
  0x86   : > { %5024 = vset.pattern.permute.xlu1 %v5407_v16 }
  0x87   : > { %801 = vperm.xlu1 %5024, %v700_v11  }
  0x8b   : > { %804 = vperm.xlu1 %5024, %v701_v12  }
  0x8f   : > { %5026 = vset.pattern.permute.xlu1 %v5400_v0 }
  0x90   : > { %1633 = vperm.xlu1 %5026, %v1628_v19  }
  0x94   : > { %5027 = vset.pattern.permute.xlu1 %v5401_v1 }
  0x95   : > { %1644 = vperm.xlu1 %5027, %v1627_v20  }
  0x99   : > { %5029 = vset.pattern.permute.xlu1 %v5402_v9 }
  0x9a   : > { %1658 = vperm.xlu1 %5029, %v1627_v20  }
  0x9b   : > { %v5577_v21 = vpop.permute.xlu1 %486 }
  0x9c   : > { %vm491_vm3 = vcmp.eq.s32.totalorder %v5577_v21, %v5620_v55 }
  0x9d   : > { %v4328_v63 = vsel %vm491_vm3, 1.0, %v5410_v18 }
  0x9e   : > { %1661 = vperm.xlu1 %5029, %v1628_v19  }
  0x9f   : > { %v5579_v22 = vpop.permute.xlu1 %489 }
  0xa0   : > { %vm492_vm5 = vcmp.eq.s32.totalorder %v5579_v22, %v5620_v55 }
  0xa1   : > { %v4329_v7 = vsel %vm492_vm5, 1.0, %v5410_v18 }
  0xa2   : > { %5031 = vset.pattern.permute.xlu1 %v5403_v10 }
  0xa3   : > { %1675 = vperm.xlu1 %5031, %v1628_v19  }
  0xa4   : > { %v5583_v23 = vpop.permute.xlu1 %503 }
  0xa5   : > { %vm506_vm4 = vcmp.eq.s32.totalorder %v5583_v23, %v5620_v55 }
  0xa6   : > { %v4331_v2 = vsel %vm506_vm4, 1.0, %v5410_v18 }
  0xa7   : > { %5032 = vset.pattern.permute.xlu1 %v5404_v13  ;;  %v512_v8 = vadd.f32 %v4331_v2, %v4329_v7 }
  0xa8   : > { %1686 = vperm.xlu1 %5032, %v1627_v20  }
  0xa9   : > { %v5587_v24 = vpop.permute.xlu1 %514 }
  0xaa   : > { %vm519_vm6 = vcmp.eq.s32.totalorder %v5587_v24, %v5620_v55 }
  0xab   : > { %v451_v30 = vpop.xlane.xlu0 %450  ;;  %v4332_v9 = vsel %vm519_vm6, 1.0, %v5410_v18 }
  0xac   : > { %5034 = vset.pattern.permute.xlu1 %v5405_v14  ;;  %v455_v32 = vmax.f32 %v451_v30, 1.0 }
  0xad   : > { %v5590_v25 = vpop.permute.xlu1 %517  ;;  %1700 = vperm.xlu1 %5034, %v1627_v20  }
  0xae   : > { %5330 = vrsqrt.f32 %v455_v32  ;;  %vm520_vm7 = vcmp.eq.s32.totalorder %v5590_v25, %v5620_v55 }
  0xaf   : > { %v454_v33 = vpop.xlane.xlu0 %453  ;;  %v4333_v10 = vsel %vm520_vm7, 1.0, %v5410_v18 }
  0xb0   : > { %v456_v34 = vmax.f32 %v454_v33, 1.0  ;;  %v526_v14 = vadd.f32 %v4333_v10, %v512_v8 }
  0xb1   : > { %1703 = vperm.xlu1 %5034, %v1628_v19  }
  0xb2   : > { %v5593_v26 = vpop.permute.xlu1 %528  ;;  %5332 = vrsqrt.f32 %v456_v34 }
  0xb3   : > { %vm533_vm9 = vcmp.eq.s32.totalorder %v5593_v26, %v5620_v55 }
  0xb5   : > { %5036 = vset.pattern.permute.xlu1 %v5406_v15 }
  0xb6   : > { %v5596_v27 = vpop.permute.xlu1 %531  ;;  %1717 = vperm.xlu1 %5036, %v1628_v19  }
  0xb7   : > { %v501_v43 = vpop.permute.xlu0 %500  ;;  %vm534_vm8 = vcmp.eq.s32.totalorder %v5596_v27, %v5620_v55 }
  0xb8   : > { %v5331_v39 = vpop.eup %5330  ;;  %vm505_vm2 = vcmp.eq.s32.totalorder %v501_v43, %v5620_v55  ;;  %v4335_v13 = vsel %vm534_vm8, 1.0, %v5410_v18 }
  0xb9   : > { %v468_v44 = vmul.f32 %v5331_v39, %v5535_v3  ;;  %v4330_v60 = vsel %vm505_vm2, 1.0, %v5410_v18  ;;  %v540_v23 = vadd.f32 %v4335_v13, %v526_v14 }
  0xba   : > { %5037 = vset.pattern.permute.xlu1 %v5407_v16  ;;  %v511_v3 = vadd.f32 %v4330_v60, %v4328_v63  ;;  %v4334_v16 = vsel %vm533_vm9, 1.0, %v5410_v18 }
  0xbb   : > { %v5598_v28 = vpop.permute.xlu1 %703  ;;  %1728 = vperm.xlu1 %5037, %v1627_v20   ;;  %v470_v50 = vsel %vm448_vm0, %v468_v44, 0.0 }
  0xbc   : > { %v5333_v40 = vpop.eup %5332  ;;  %v5613_v47 = vpop.permute.xlu0 %731  ;;  %v525_v12 = vadd.f32 %v4332_v9, %v511_v3  ;;  %vm708_vm6 = vcmp.eq.s32.totalorder %v5598_v28, %v5620_v55 }
  0xbd   : > { %v469_v45 = vmul.f32 %v5333_v40, %v5539_v6  ;;  %v466_v6 = vmax.f32 %v465_v62, 1.0  ;;  %vm736_vm9 = vcmp.eq.s32.totalorder %v5613_v47, %v5620_v55 }
  0xbe   : > { %v539_v24 = vadd.f32 %v4334_v16, %v525_v12  ;;  %v4349_v60 = vsel %vm736_vm9, 1.0, %v5410_v18 }
  0xbf   : > { %v5601_v29 = vpop.permute.xlu1 %706  ;;  %v471_v51 = vsel %vm448_vm0, %v469_v45, 0.0  ;;  %5334 = vrsqrt.f32 %v466_v6 }
  0xc0   : > { %v472_v53 = vadd.f32 %v471_v51, %v470_v50  ;;  %vm709_vm7 = vcmp.eq.s32.totalorder %v5601_v29, %v5620_v55  ;;  %v4345_v29 = vsel %vm708_vm6, 1.0, %v5410_v18  ;;  %vm1126_vm6 = vcmask 654336  }
  0xc1   : > { %v5617_v54 = vpop.permute.xlu0 %762  ;;  %v4346_v51 = vsel %vm709_vm7, 1.0, %v5410_v18 }
  0xc2   : > { %v473_v58 = vrot.slane %v472_v53, 4 }
  0xc4   : > { %v5603_v31 = vpop.permute.xlu1 %717  ;;  %v474_v1 = vadd.f32 %v473_v58, %v472_v53 }
  0xc5   : > { %vm722_vm3 = vcmp.eq.s32.totalorder %v5603_v31, %v5620_v55 }
  0xc6   : > { %v560_v61 = vpop.permute.xlu0 %559  ;;  %v475_v11 = vrot.slane %v474_v1, 2 }
  0xc7   : > { %vm562_vm13 = vcmp.eq.s32.totalorder %v560_v61, %v5620_v55 }
  0xc8   : > { %v5605_v35 = vpop.permute.xlu1 %720  ;;  %v476_v22 = vadd.f32 %v475_v11, %v474_v1  ;;  %v4339_v30 = vsel %vm562_vm13, 1.0, %v5410_v18 }
  0xc9   : > { %vm723_vm4 = vcmp.eq.s32.totalorder %v5605_v35, %v5620_v55  ;;  %v5335_v43 = vpop.eup %5334  ;;  %v4347_v35 = vsel %vm722_vm3, 1.0, %v5410_v18 }
  0xca   : > { %v5640_v4 = vpop.permute.xlu0 %773  ;;  %v477_v33 = vrot.slane %v476_v22, 1  ;;  %v4348_v46 = vsel %vm723_vm4, 1.0, %v5410_v18  ;;  %v728_v57 = vadd.f32 %v4347_v35, %v4345_v29  ;;  %v903_v35 = vld [vmem:[%s6963_s5 + $0x88] sm:$0xff]  ;;  %v914_v29 = vld [vmem:[%s6963_s5 + $0xe0] sm:$0xff] }
  0xcb   : > { %v729_v58 = vadd.f32 %v4348_v46, %v4346_v51  ;;  %v907_v46 = vld [vmem:[%s6963_s5 + $0xa8] sm:$0xff] }
  0xcc   : > { %v478_v41 = vadd.f32 %v477_v33, %v476_v22  ;;  %v742_v63 = vadd.f32 %v4349_v60, %v728_v57  ;;  %v911_v51 = vld [vmem:[%s6963_s5 + $0xc8] sm:$0xff] }
  0xcd   : > { %v543_v36 = vpop.permute.xlu1 %542 }
  0xce   : > { %vm547_vm10 = vcmp.eq.s32.totalorder %v543_v36, %v5620_v55  ;;  %v479_v28 = vmul.f32 %v5335_v43, %v478_v41  ;;  %v899_v41 = vld [vmem:[%s6963_s5 + $0x68] sm:$0xff]  ;;  %v902_v43 = vld [vmem:[%s6963_s5 + $0x80] sm:$0xff] }
  0xcf   : > { %v4336_v19 = vsel %vm547_vm10, 1.0, %v5410_v18  ;;  %v571_v21 = vpop.permute.xlu0 %570 }
  0xd0   : > { %v553_v26 = vadd.f32 %v4336_v19, %v539_v24  ;;  %vm575_vm14 = vcmp.eq.s32.totalorder %v571_v21, %v5620_v55  ;;  %v5696_v61 = vmul.f32 0.0625, %v479_v28  ;;  %v886_v24 = vld [vmem:[%s6963_s5] sm:$0xff] }
  0xd1   : > { %v546_v37 = vpop.permute.xlu1 %545  ;;  %v4340_v36 = vsel %vm575_vm14, 1.0, %v5410_v18  ;;  %v910_v28 = vld [vmem:[%s6963_s5 + $0xc0] sm:$0xff] }
  0xd2   : > { %vm548_vm11 = vcmp.eq.s32.totalorder %v546_v37, %v5620_v55  ;;  %v4387_v57 = vcombine.high %v910_v28, %v914_v29  ;;  %v4386_v60 = vcombine.low %v910_v28, %v914_v29  ;;  %v920_v28 = vld [vmem:[%s6963_s5 + $0x110] sm:$0xff] }
  0xd3   : > { %v4337_v20 = vsel %vm548_vm11, 1.0, %v5410_v18  ;;  %v791_v3 = vpop.permute.xlu0 %790 }
  0xd4   : > { %v554_v27 = vadd.f32 %v4337_v20, %v540_v23 }
  0xd6   : > { %v5609_v42 = vpop.permute.xlu1 %734  ;;  %v568_v38 = vadd.f32 %v4339_v30, %v554_v27  ;;  %v891_v30 = vld [vmem:[%s6963_s5 + $0x28] sm:$0xff] }
  0xd7   : > { %vm737_vm8 = vcmp.eq.s32.totalorder %v5609_v42, %v5620_v55 }
  0xd8   : > { %v4350_v42 = vsel %vm737_vm8, 1.0, %v5410_v18 }
  0xdb   : > { %v557_v48 = vpop.permute.xlu1 %556 }
  0xdc   : > { %vm561_vm12 = vcmp.eq.s32.totalorder %v557_v48, %v5620_v55 }
  0xdd   : > { %v4338_v25 = vsel %vm561_vm12, 1.0, %v5410_v18  ;;  %vm765_vm12 = vcmp.eq.s32.totalorder %v5617_v54, %v5620_v55 }
  0xde   : > { %v567_v34 = vadd.f32 %v4338_v25, %v553_v26  ;;  %v4354_v54 = vsel %vm765_vm12, 1.0, %v5410_v18  ;;  %v890_v25 = vld [vmem:[%s6963_s5 + $0x20] sm:$0xff]  ;;  %v887_v26 = vld [vmem:[%s6963_s5 + $0x8] sm:$0xff] }
  0xdf   : > { %v4363_v27 = vcombine.high %v886_v24, %v890_v25  ;;  %v4365_v33 = vcombine.high %v887_v26, %v891_v30 }
  0xe0   : > { %v5622_v56 = vpop.permute.xlu1 %745  ;;  %v581_v44 = vadd.f32 %v4340_v36, %v567_v34  ;;  %v4364_v34 = vcombine.low %v887_v26, %v891_v30  ;;  %v894_v36 = vld [vmem:[%s6963_s5 + $0x40] sm:$0xff] }
  0xe1   : > { %vm750_vm11 = vcmp.eq.s32.totalorder %v5622_v56, %v5620_v55  ;;  %1171 = vmatprep.subr.bf16.mxu1 %v4365_v33  ;;  %v908_v33 = vld [vmem:[%s6963_s5 + $0xb0] sm:$0xff] }
  0xe2   : > { %v4351_v62 = vsel %vm750_vm11, 1.0, %v5410_v18  ;;  %1172 = vmatpush1.bf16.msra.mxu1 %v4364_v34  ;;  %v905_v34 = vld [vmem:[%s6963_s5 + $0x98] sm:$0xff] }
  0xe4   : > { %v5627_v59 = vpop.permute.xlu1 %748 }
  0xe5   : > { %vm751_vm10 = vcmp.eq.s32.totalorder %v5627_v59, %v5620_v55  ;;  %v743_v59 = vadd.f32 %v4350_v42, %v729_v58  ;;  %v915_v42 = vld [vmem:[%s6963_s5 + $0xe8] sm:$0xff] }
  0xe6   : > { %v4352_v47 = vsel %vm751_vm10, 1.0, %v5410_v18  ;;  %v4389_v58 = vcombine.high %v911_v51, %v915_v42 }
  0xe7   : > { %v757_v56 = vadd.f32 %v4352_v47, %v743_v59  ;;  %v4388_v47 = vcombine.low %v911_v51, %v915_v42  ;;  %v918_v59 = vld [vmem:[%s6963_s5 + $0x100] sm:$0xff]  ;;  %v1631_v51 = vpop.permute.xlu0 %1630  ;;  %v924_v42 = vld [vmem:[%s6963_s5 + $0x130] sm:$0xff] }
  0xe8   : > { %vm1635_vm9 = vcmp.eq.s32.totalorder %v1631_v51, %v5620_v55 }
  0xe9   : > { %v574_v5 = vpop.permute.xlu1 %573  ;;  %v771_v8 = vadd.f32 %v4354_v54, %v757_v56 }
  0xea   : > { %vm576_vm15 = vcmp.eq.s32.totalorder %v574_v5, %v5620_v55  ;;  %v756_v5 = vadd.f32 %v4351_v62, %v742_v63  ;;  %v922_v62 = vld [vmem:[%s6963_s5 + $0x120] sm:$0xff]  ;;  %v919_v63 = vld [vmem:[%s6963_s5 + $0x108] sm:$0xff] }
  0xeb   : > { %v4341_v37 = vsel %vm576_vm15, 1.0, %v5410_v18  ;;  %vm778_vm15 = vcmp.eq.s32.totalorder %v5640_v4, %v5620_v55  ;;  %v4395_v56 = vcombine.high %v918_v59, %v922_v62  ;;  %v4394_v54 = vcombine.low %v918_v59, %v922_v62  ;;  %v672_v59 = vld [vmem:[%s6962_s4] sm:$0xff] }
  0xec   : > { %v582_v45 = vadd.f32 %v4341_v37, %v568_v38  ;;  %v4355_v9 = vsel %vm778_vm15, 1.0, %v5410_v18  ;;  %v898_v37 = vld [vmem:[%s6963_s5 + $0x60] sm:$0xff]  ;;  %v895_v38 = vld [vmem:[%s6963_s5 + $0x48] sm:$0xff]  ;;  %vm1438_vm15 = vcmask 1040384  }
  0xed   : > { %v676_v62 = vld [vmem:[%s6962_s4 + $0x20] sm:$0xff] }
  0xee   : > { %v5653_v15 = vpop.permute.xlu1 %759 }
  0xef   : > { %vm764_vm13 = vcmp.eq.s32.totalorder %v5653_v15, %v5620_v55 }
  0xf0   : > { %v4353_v2 = vsel %vm764_vm13, 1.0, %v5410_v18 }
  0xf1   : > { %v770_v7 = vadd.f32 %v4353_v2, %v756_v5  ;;  %v888_v5 = vld [vmem:[%s6963_s5 + $0x10] sm:$0xff] }
  0xf3   : > { %v585_v32 = vpop.permute.xlu1 %584  ;;  %v784_v4 = vadd.f32 %v4355_v9, %v770_v7  ;;  %v889_v7 = vld [vmem:[%s6963_s5 + $0x18] sm:$0xff] }
  0xf4   : > { %vm589_vm2 = vcmp.eq.s32.totalorder %v585_v32, %v5620_v55  ;;  %v4362_v32 = vcombine.low %v886_v24, %v890_v25  ;;  %v893_v9 = vld [vmem:[%s6963_s5 + $0x38] sm:$0xff] }
  0xf5   : > { %v4342_v39 = vsel %vm589_vm2, 1.0, %v5410_v18  ;;  %vm793_vm2 = vcmp.eq.s32.totalorder %v791_v3, %v5620_v55 }
  0xf6   : > { %v595_v48 = vadd.f32 %v4342_v39, %v581_v44  ;;  %v4358_v12 = vsel %vm793_vm2, 1.0, %v5410_v18  ;;  %v4370_v39 = vcombine.low %v894_v36, %v898_v37  ;;  %v906_v44 = vld [vmem:[%s6963_s5 + $0xa0] sm:$0xff] }
  0xf7   : > { %v588_v40 = vpop.permute.xlu1 %587 }
  0xf8   : > { %vm590_vm5 = vcmp.eq.s32.totalorder %v588_v40, %v5620_v55  ;;  %v4371_v40 = vcombine.high %v894_v36, %v898_v37  ;;  %v909_v36 = vld [vmem:[%s6963_s5 + $0xb8] sm:$0xff] }
  0xf9   : > { %v4343_v31 = vsel %vm590_vm5, 1.0, %v5410_v18 }
  0xfa   : > { %v596_v50 = vadd.f32 %v4343_v31, %v582_v45  ;;  %v4373_v45 = vcombine.high %v895_v38, %v899_v41  ;;  %v4372_v31 = vcombine.low %v895_v38, %v899_v41  ;;  %v4385_v41 = vcombine.high %v905_v34, %v909_v36 }
  0xfc   : > { %v777_v52 = vpop.permute.xlu1 %776  ;;  %v4902_v53 = vpack.c.bf16 %v596_v50, %v595_v48  ;;  %v4379_v48 = vcombine.high %v902_v43, %v906_v44  ;;  %v4381_v50 = vcombine.high %v903_v35, %v907_v46  ;;  %1173 = vmatprep.subr.bf16.mxu1 %v4373_v45  ;;  %v913_v45 = vld [vmem:[%s6963_s5 + $0xd8] sm:$0xff] }
  0xfd   : > { %vm779_vm14 = vcmp.eq.s32.totalorder %v777_v52, %v5620_v55  ;;  %v4378_v52 = vcombine.low %v902_v43, %v906_v44  ;;  %1174 = vmatpush1.bf16.msra.mxu1 %v4372_v31  ;;  %v912_v43 = vld [vmem:[%s6963_s5 + $0xd0] sm:$0xff]  ;;  %v917_v31 = vld [vmem:[%s6963_s5 + $0xf8] sm:$0xff] }
  0xfe   : > { %4903 = vmatpush3.bf16.msra.mxu0 %v4902_v53  ;;  %v4356_v6 = vsel %vm779_vm14, 1.0, %v5410_v18  ;;  %v4380_v53 = vcombine.low %v903_v35, %v907_v46  ;;  %1175 = vmatprep.subr.bf16.mxu1 %v4381_v50  ;;  %v916_v44 = vld [vmem:[%s6963_s5 + $0xf0] sm:$0xff]  ;;  %v4384_v46 = vcombine.low %v905_v34, %v909_v36  ;;  %v4393_v50 = vcombine.high %v913_v45, %v917_v31 }
  0xff   : > { %4904 = vmatprep.subr.bf16.mxu0 %v5408_v17  ;;  %v785_v11 = vadd.f32 %v4356_v6, %v771_v8  ;;  %v892_v6 = vld [vmem:[%s6963_s5 + $0x30] sm:$0xff] }
 0x100   : > { %v4367_v8 = vcombine.high %v888_v5, %v892_v6 }
 0x101   : > { %v788_v1 = vpop.permute.xlu1 %787  ;;  %4875 = vmatmul.mubr.msk.f32.vlgmr.msra.gmra.mrb[0].mxu0 %vm448_vm0, %v5696_v61  ;;  %v799_v16 = vadd.f32 %v4358_v12, %v785_v11  ;;  %1176 = vmatpush1.bf16.msra.mxu1 %v4380_v53  ;;  %v4368_v11 = vcombine.low %v889_v7, %v893_v9  ;;  %v4369_v12 = vcombine.high %v889_v7, %v893_v9  ;;  %v925_v53 = vld [vmem:[%s6963_s5 + $0x138] sm:$0xff]  ;;  %v680_v7 = vld [vmem:[%s6962_s4 + $0x40] sm:$0xff]  ;;  %v681_v9 = vld [vmem:[%s6962_s4 + $0x48] sm:$0xff] }
 0x102   : > { %4881 = vmatprep.mubr.msk.f32.mxu0 %vm5409_vm1, %v5410_v18  ;;  %vm792_vm3 = vcmp.eq.s32.totalorder %v788_v1, %v5620_v55  ;;  %1177 = vmatprep.subr.bf16.mxu1 %v4389_v58  ;;  %v923_v1 = vld [vmem:[%s6963_s5 + $0x128] sm:$0xff]  ;;  %v4392_v58 = vcombine.low %v913_v45, %v917_v31 }
 0x103   : > { %v4357_v13 = vsel %vm792_vm3, 1.0, %v5410_v18  ;;  %v4397_v2 = vcombine.high %v919_v63, %v923_v1  ;;  %v4396_v3 = vcombine.low %v919_v63, %v923_v1  ;;  %v673_v63 = vld [vmem:[%s6962_s4 + $0x8] sm:$0xff] }
 0x104   : > { %v798_v19 = vadd.f32 %v4357_v13, %v784_v4 }
 0x105   : > { %1178 = vmatpush1.bf16.msra.mxu1 %v4388_v47 }
 0x106   : > { %v802_v10 = vpop.permute.xlu1 %801  ;;  %1179 = vmatprep.subr.bf16.mxu1 %v4397_v2  ;;  %v4398_v2 = vcombine.low %v920_v28, %v924_v42 }
 0x107   : > { %vm806_vm4 = vcmp.eq.s32.totalorder %v802_v10, %v5620_v55  ;;  %v4366_v10 = vcombine.low %v888_v5, %v892_v6  ;;  %v4407_v5 = vcombine.high %v672_v59, %v676_v62 }
 0x108   : > { %v4359_v14 = vsel %vm806_vm4, 1.0, %v5410_v18 }
 0x109   : > { %v812_v21 = vadd.f32 %v4359_v14, %v798_v19  ;;  %1180 = vmatpush1.bf16.msra.mxu1 %v4396_v3 }
 0x10a   : > { %v805_v15 = vpop.permute.xlu1 %804  ;;  %1253 = vmatprep.subr.bf16.mxu1 %v4369_v12 }
 0x10b   : > { %vm807_vm5 = vcmp.eq.s32.totalorder %v805_v15, %v5620_v55 }
 0x10c   : > { %v4360_v20 = vsel %vm807_vm5, 1.0, %v5410_v18 }
 0x10d   : > { %v813_v22 = vadd.f32 %v4360_v20, %v799_v16  ;;  %v896_v16 = vld [vmem:[%s6963_s5 + $0x50] sm:$0xff] }
 0x10f   : > { %v4905_v23 = vpack.c.bf16 %v813_v22, %v812_v21  ;;  %v5796_v14 = vpop.permute.xlu1 %1633  ;;  %v900_v21 = vld [vmem:[%s6963_s5 + $0x70] sm:$0xff]  ;;  %v897_v22 = vld [vmem:[%s6963_s5 + $0x58] sm:$0xff] }
 0x110   : > { %v4374_v38 = vcombine.low %v896_v16, %v900_v21  ;;  %vm1636_vm7 = vcmp.eq.s32.totalorder %v5796_v14, %v5620_v55 }
 0x111   : > { %4906 = vmatpush3.bf16.msra.mxu0 %v4905_v23  ;;  %v901_v23 = vld [vmem:[%s6963_s5 + $0x78] sm:$0xff]  ;;  %v4447_v14 = vsel %vm1636_vm7, 1.0, %v5410_v18 }
 0x112   : > { %1130 = vmatprep.subr.bf16.mxu0 %v4363_v27  ;;  %v4375_v27 = vcombine.high %v896_v16, %v900_v21  ;;  %v4377_v30 = vcombine.high %v897_v22, %v901_v23 }
 0x114   : > { %4882 = vmatmul.mubr.msk.f32.vlgmr.msra.gmra.mrb[2].mxu0 %vm448_vm0, %v5696_v61  ;;  %v5798_v15 = vpop.permute.xlu1 %1644 }
 0x115   : > { %1162 = vmatprep.mubr.bf16.mxu0 %v5400_v0  ;;  %1131 = vmatpush1.bf16.msra.mxu0 %v4362_v32  ;;  %v904_v32 = vld [vmem:[%s6963_s5 + $0x90] sm:$0xff]  ;;  %vm1649_vm8 = vcmp.eq.s32.totalorder %v5798_v15, %v5620_v55 }
 0x116   : > { %1132 = vmatprep.subr.bf16.mxu0 %v4371_v40  ;;  %v4383_v40 = vcombine.high %v904_v32, %v908_v33  ;;  %v4382_v35 = vcombine.low %v904_v32, %v908_v33 }
 0x119   : > { %1133 = vmatpush1.bf16.msra.mxu0 %v4370_v39  ;;  %v5803_v19 = vpop.permute.xlu1 %1658  ;;  %v4376_v39 = vcombine.low %v897_v22, %v901_v23  ;;  %v692_v23 = vld [vmem:[%s6962_s4 + $0xa0] sm:$0xff] }
 0x11a   : > { %1134 = vmatprep.subr.bf16.mxu0 %v4379_v48  ;;  %v4391_v48 = vcombine.high %v912_v43, %v916_v44  ;;  %vm1663_vm11 = vcmp.eq.s32.totalorder %v5803_v19, %v5620_v55 }
 0x11d   : > { %1135 = vmatpush1.bf16.msra.mxu0 %v4378_v52  ;;  %v5832_v37 = vpop.permute.xlu1 %1661  ;;  %v921_v52 = vld [vmem:[%s6963_s5 + $0x118] sm:$0xff] }
 0x11e   : > { %1136 = vmatprep.subr.bf16.mxu0 %v4387_v57  ;;  %v4390_v57 = vcombine.low %v912_v43, %v916_v44  ;;  %v4401_v47 = vcombine.high %v921_v52, %v925_v53  ;;  %v4400_v3 = vcombine.low %v921_v52, %v925_v53  ;;  %vm1664_vm12 = vcmp.eq.s32.totalorder %v5832_v37, %v5620_v55  ;;  %v674_v37 = vld [vmem:[%s6962_s4 + $0x10] sm:$0xff]  ;;  %v675_v52 = vld [vmem:[%s6962_s4 + $0x18] sm:$0xff] }
 0x11f   : > { %v4451_v43 = vsel %vm1664_vm12, 1.0, %v5410_v18  ;;  %v679_v53 = vld [vmem:[%s6962_s4 + $0x38] sm:$0xff]  ;;  %vm4117_vm12 = vcmask 1045504  }
 0x121   : > { %1137 = vmatpush1.bf16.msra.mxu0 %v4386_v60  ;;  %v4399_v60 = vcombine.high %v920_v28, %v924_v42  ;;  %v678_v42 = vld [vmem:[%s6962_s4 + $0x30] sm:$0xff] }
 0x122   : > { %1138 = vmatprep.subr.bf16.mxu0 %v4395_v56  ;;  %v5851_v29 = vpop.permute.xlu1 %1675  ;;  %v677_v56 = vld [vmem:[%s6962_s4 + $0x28] sm:$0xff] }
 0x123   : > { %v4409_v6 = vcombine.high %v673_v63, %v677_v56  ;;  %v4408_v12 = vcombine.low %v673_v63, %v677_v56  ;;  %vm1678_vm13 = vcmp.eq.s32.totalorder %v5851_v29, %v5620_v55  ;;  %v682_v63 = vld [vmem:[%s6962_s4 + $0x50] sm:$0xff] }
 0x125   : > { %1139 = vmatpush1.bf16.msra.mxu0 %v4394_v54  ;;  %v1648_v54 = vpop.permute.xlu0 %1647 }
 0x126   : > { %1212 = vmatprep.subr.bf16.mxu0 %v4367_v8  ;;  %v684_v8 = vld [vmem:[%s6962_s4 + $0x60] sm:$0xff]  ;;  %vm1650_vm10 = vcmp.eq.s32.totalorder %v1648_v54, %v5620_v55 }
 0x127   : > { %v5874_v1 = vpop.permute.xlu1 %1686  ;;  %v4449_v32 = vsel %vm1650_vm10, 1.0, %v5410_v18  ;;  %v4414_v15 = vcombine.low %v680_v7, %v684_v8 }
 0x128   : > { %vm1691_vm2 = vcmp.eq.s32.totalorder %v5874_v1, %v5620_v55 }
 0x129   : > { %v1673_v22 = vpop.permute.xlu0 %1672 }
 0x12a   : > { %vm1677_vm14 = vcmp.eq.s32.totalorder %v1673_v22, %v5620_v55  ;;  %v691_v22 = vld [vmem:[%s6962_s4 + $0x98] sm:$0xff] }
 0x12c   : > { %v5898_v21 = vpop.permute.xlu1 %1700 }
 0x12d   : > { %v1690_v45 = vpop.permute.xlu0 %1689  ;;  %vm1705_vm4 = vcmp.eq.s32.totalorder %v5898_v21, %v5620_v55 }
 0x12e   : > { %vm1692_vm3 = vcmp.eq.s32.totalorder %v1690_v45, %v5620_v55 }
 0x130   : > { %v1704_v44 = vpop.permute.xlu1 %1703 }
 0x131   : > { %vm1706_vm5 = vcmp.eq.s32.totalorder %v1704_v44, %v5620_v55 }
 0x1d4   : > { %v5794_v13 = vpop.f32.mrb[0].mxu0 }
 0x1d5   : > { %v4876_v4 = vpop.f32.mrb[1].mxu0 }
 0x1d6   : > { %v4415_v4 = vcombine.high %v680_v7, %v684_v8  ;;  %v4454_v7 = vsel %vm1691_vm2, 1.0, %v5410_v18  ;;  %v4455_v8 = vsel %vm1692_vm3, 1.0, %v5410_v18 }
 0x1e7   : > { %v880_v20 = vpop.f32.mrb[2].mxu0 }
 0x1e8   : > { %v884_v24 = vmul.f32 0.125, %v880_v20  ;;  %v4883_v25 = vpop.f32.mrb[3].mxu0  ;;  %v688_v20 = vld [vmem:[%s6962_s4 + $0x80] sm:$0xff] }
 0x1e9   : > { %v693_v25 = vld [vmem:[%s6962_s4 + $0xa8] sm:$0xff]  ;;  %v4423_v34 = vcombine.high %v688_v20, %v692_v23  ;;  %v4422_v31 = vcombine.low %v688_v20, %v692_v23  ;;  %v695_v23 = vld [vmem:[%s6962_s4 + $0xb8] sm:$0xff] }
 0x1ea   : > { %v5814_v26 = vpack.c.bf16 %v884_v24, %v884_v24  ;;  %v689_v24 = vld [vmem:[%s6962_s4 + $0x88] sm:$0xff] }
 0x1eb   : > { %v4425_v36 = vcombine.high %v689_v24, %v693_v25 }
 0x1ec   : > { %4402 = vmatmul.mubr.msk.bf16.vlgmr.msra.gmra.mrb[4].mxu0 %vm1126_vm6, %v5814_v26  ;;  %4403 = vmatmul.mubr.msk.bf16.vlgmr.msra.gmra.mrb[0].mxu1 %vm1126_vm6, %v5814_v26 }
 0x1ed   : > { %1213 = vmatpush1.bf16.msra.mxu0 %v4366_v10  ;;  %1254 = vmatpush1.bf16.msra.mxu1 %v4368_v11  ;;  %v685_v10 = vld [vmem:[%s6962_s4 + $0x68] sm:$0xff]  ;;  %v4406_v11 = vcombine.low %v672_v59, %v676_v62  ;;  %v4411_v59 = vcombine.high %v674_v37, %v678_v42  ;;  %v4413_v62 = vcombine.high %v675_v52, %v679_v53 }
 0x1ee   : > { %1214 = vmatprep.subr.bf16.mxu0 %v4375_v27  ;;  %1255 = vmatprep.subr.bf16.mxu1 %v4377_v30  ;;  %v4417_v16 = vcombine.high %v681_v9, %v685_v10  ;;  %v4448_v27 = vsel %vm1649_vm8, 1.0, %v5410_v18  ;;  %v4446_v30 = vsel %vm1635_vm9, 1.0, %v5410_v18  ;;  %v4416_v33 = vcombine.low %v681_v9, %v685_v10 }
 0x1ef   : > { %1244 = vmatprep.mubr.bf16.mxu0 %v5400_v0  ;;  %1285 = vmatprep.mubr.bf16.mxu1 %v5400_v0  ;;  %v4410_v9 = vcombine.low %v674_v37, %v678_v42  ;;  %v4412_v10 = vcombine.low %v675_v52, %v679_v53  ;;  %v1817_v52 = vld [vmem:[%s6964_s6 + $0x20] sm:$0xff] }
 0x1f1   : > { %1215 = vmatpush1.bf16.msra.mxu0 %v4374_v38  ;;  %1256 = vmatpush1.bf16.msra.mxu1 %v4376_v39  ;;  %v696_v38 = vld [vmem:[%s6962_s4 + $0xc0] sm:$0x11]  ;;  %v1655_v39 = vadd.f32 %v4448_v27, %v4446_v30 }
 0x1f2   : > { %1216 = vmatprep.subr.bf16.mxu0 %v4383_v40  ;;  %1257 = vmatprep.subr.bf16.mxu1 %v4385_v41  ;;  %v1656_v40 = vadd.f32 %v4449_v32, %v4447_v14  ;;  %v4450_v41 = vsel %vm1663_vm11, 1.0, %v5410_v18  ;;  %v4431_v19 = vcombine.high %v696_v38, %v696_v38  ;;  %v694_v14 = vld [vmem:[%s6962_s4 + $0xb0] sm:$0xff]  ;;  %vm2125_vm11 = vcmask 818176  }
 0x1f3   : > { %v1669_v51 = vadd.f32 %v4450_v41, %v1655_v39  ;;  %v699_v39 = vld [vmem:[%s6962_s4 + $0xd8] sm:$0x11] }
 0x1f4   : > { %v1670_v28 = vadd.f32 %v4451_v43, %v1656_v40  ;;  %v4428_v43 = vcombine.low %v691_v22, %v695_v23  ;;  %v4437_v45 = vcombine.high %v699_v39, %v699_v39 }
 0x1f5   : > { %1217 = vmatpush1.bf16.msra.mxu0 %v4382_v35  ;;  %1258 = vmatpush1.bf16.msra.mxu1 %v4384_v46  ;;  %v4424_v35 = vcombine.low %v689_v24, %v693_v25  ;;  %v4430_v46 = vcombine.low %v696_v38, %v696_v38  ;;  %v4456_v24 = vsel %vm1705_vm4, 1.0, %v5410_v18  ;;  %v4457_v25 = vsel %vm1706_vm5, 1.0, %v5410_v18 }
 0x1f6   : > { %1218 = vmatprep.subr.bf16.mxu0 %v4391_v48  ;;  %1259 = vmatprep.subr.bf16.mxu1 %v4393_v50 }
 0x1f9   : > { %1219 = vmatpush1.bf16.msra.mxu0 %v4390_v57  ;;  %1260 = vmatpush1.bf16.msra.mxu1 %v4392_v58  ;;  %v4453_v57 = vsel %vm1678_vm13, 1.0, %v5410_v18  ;;  %v4452_v58 = vsel %vm1677_vm14, 1.0, %v5410_v18  ;;  %vm4113_vm13 = vcmask 359424  }
 0x1fa   : > { %1220 = vmatprep.subr.bf16.mxu0 %v4399_v60  ;;  %1261 = vmatprep.subr.bf16.mxu1 %v4401_v47  ;;  %v1440_v60 = vsel %vm1438_vm15, %v4430_v46, 0  ;;  %v670_v47 = vmul.f32 0.125, %v5794_v13  ;;  %v1683_v56 = vadd.f32 %v4452_v58, %v1669_v51  ;;  %v1684_v54 = vadd.f32 %v4453_v57, %v1670_v28  ;;  %v686_v13 = vld [vmem:[%s6962_s4 + $0x70] sm:$0xff]  ;;  %v1816_v57 = vld [vmem:[%s6964_s6 + $0x18] sm:$0xff] }
 0x1fb   : > { %v4419_v1 = vcombine.high %v682_v63, %v686_v13  ;;  %v4418_v21 = vcombine.low %v682_v63, %v686_v13  ;;  %v1820_v58 = vld [vmem:[%s6964_s6 + $0x38] sm:$0xff]  ;;  %v1829_v13 = vld [vmem:[%s6964_s6 + $0x80] sm:$0xff] }
 0x1fc   : > { %v1698_v20 = vadd.f32 %v4455_v8, %v1684_v54  ;;  %v1824_v63 = vld [vmem:[%s6964_s6 + $0x58] sm:$0xff] }
 0x1fd   : > { %1221 = vmatpush1.bf16.msra.mxu0 %v4398_v2  ;;  %1262 = vmatpush1.bf16.msra.mxu1 %v4400_v3  ;;  %v1718_v2 = vpop.permute.xlu1 %1717  ;;  %v1715_v3 = vpop.permute.xlu0 %1714  ;;  %v1836_v8 = vld [vmem:[%s6964_s6 + $0xb8] sm:$0xff] }
 0x1fe   : > { %1463 = vmatprep.subr.bf16.mxu0 %v4407_v5  ;;  %1504 = vmatprep.subr.bf16.mxu1 %v4409_v6  ;;  %v683_v5 = vld [vmem:[%s6962_s4 + $0x58] sm:$0xff]  ;;  %vm1719_vm7 = vcmp.eq.s32.totalorder %v1715_v3, %v5620_v55  ;;  %vm1720_vm8 = vcmp.eq.s32.totalorder %v1718_v2, %v5620_v55 }
 0x1ff   : > { %v687_v6 = vld [vmem:[%s6962_s4 + $0x78] sm:$0xff]  ;;  %v4459_v40 = vsel %vm1720_vm8, 1.0, %v5410_v18 }
 0x200   : > { %4404 = vmatmul.mubr.msk.bf16.vlgmr.msra.gmra.mrb[8].mxu0 %vm1126_vm6, %v5814_v26  ;;  %4405 = vmatmul.mubr.msk.bf16.vlgmr.msra.gmra.mrb[4].mxu1 %vm1126_vm6, %v5814_v26  ;;  %v697_v26 = vld [vmem:[%s6962_s4 + $0xc8] sm:$0x11]  ;;  %vm1434_vm6 = vcmask 408576   ;;  %v4420_v32 = vcombine.low %v683_v5, %v687_v6 }
 0x201   : > { %1464 = vmatpush1.bf16.msra.mxu0 %v4406_v11  ;;  %1505 = vmatpush1.bf16.msra.mxu1 %v4408_v12  ;;  %v4433_v48 = vcombine.high %v697_v26, %v697_v26  ;;  %v4432_v50 = vcombine.low %v697_v26, %v697_v26  ;;  %v5995_v11 = vpack.c.bf16 %v670_v47, %v670_v47  ;;  %v1729_v27 = vpop.permute.xlu1 %1728  ;;  %v1732_v30 = vpop.permute.xlu0 %1731  ;;  %v4458_v26 = vsel %vm1719_vm7, 1.0, %v5410_v18 }
 0x202   : > { %1465 = vmatprep.subr.bf16.mxu0 %v4415_v4  ;;  %1506 = vmatprep.subr.bf16.mxu1 %v4417_v16  ;;  %v4421_v12 = vcombine.high %v683_v5, %v687_v6  ;;  %v690_v4 = vld [vmem:[%s6962_s4 + $0x90] sm:$0xff]  ;;  %v1697_v16 = vadd.f32 %v4454_v7, %v1683_v56  ;;  %vm1733_vm9 = vcmp.eq.s32.totalorder %v1729_v27, %v5620_v55  ;;  %v1828_v56 = vld [vmem:[%s6964_s6 + $0x78] sm:$0xff]  ;;  %v1833_v5 = vld [vmem:[%s6964_s6 + $0xa0] sm:$0xff] }
 0x203   : > { %1495 = vmatprep.mubr.bf16.mxu0 %v5400_v0  ;;  %1536 = vmatprep.mubr.bf16.mxu1 %v5400_v0  ;;  %v1446_v29 = vsel %vm1438_vm15, %v4432_v50, 0  ;;  %vm1734_vm10 = vcmp.eq.s32.totalorder %v1732_v30, %v5620_v55  ;;  %v4426_v41 = vcombine.low %v690_v4, %v694_v14  ;;  %v4469_v47 = vcombine.low %v1816_v57, %v1820_v58  ;;  %v1832_v6 = vld [vmem:[%s6964_s6 + $0x98] sm:$0xff] }
 0x204   : > { %v1711_v38 = vadd.f32 %v4456_v24, %v1697_v16  ;;  %v4461_v50 = vsel %vm1734_vm10, 1.0, %v5410_v18  ;;  %v4477_v2 = vcombine.low %v1824_v63, %v1828_v56  ;;  %v4478_v3 = vcombine.high %v1824_v63, %v1828_v56  ;;  %v1848_v24 = vld [vmem:[%s6964_s6 + $0x118] sm:$0xff]  ;;  %v5055_v63 = vld [vmem:[%s6965_s7] ss:$12 sps:$4 sm:$0xff]  }
 0x205   : > { %1466 = vmatpush1.bf16.msra.mxu0 %v4414_v15  ;;  %1507 = vmatpush1.bf16.msra.mxu1 %v4416_v33  ;;  %v4427_v15 = vcombine.high %v690_v4, %v694_v14  ;;  %v4429_v33 = vcombine.high %v691_v22, %v695_v23  ;;  %v4480_v7 = vcombine.high %v1829_v13, %v1833_v5  ;;  %v1844_v4 = vld [vmem:[%s6964_s6 + $0xf8] sm:$0xff]  ;;  %v1845_v22 = vld [vmem:[%s6964_s6 + $0x100] sm:$0xff]  ;;  %v1830_v56 = vld [vmem:[%s6964_s6 + $0x88] sm:$0xff] }
 0x206   : > { %1467 = vmatprep.subr.bf16.mxu0 %v4423_v34  ;;  %1508 = vmatprep.subr.bf16.mxu1 %v4425_v36  ;;  %v698_v34 = vld [vmem:[%s6962_s4 + $0xd0] sm:$0x11]  ;;  %v1712_v36 = vadd.f32 %v4457_v25, %v1698_v20  ;;  %v4485_v16 = vcombine.low %v1832_v6, %v1836_v8  ;;  %v1849_v23 = vld [vmem:[%s6964_s6 + $0x120] sm:$0xff]  ;;  %v1852_v25 = vld [vmem:[%s6964_s6 + $0x138] sm:$0xff] }
 0x207   : > { %v4435_v44 = vcombine.high %v698_v34, %v698_v34 }
 0x208   : > { %v1726_v46 = vadd.f32 %v4459_v40, %v1712_v36  ;;  %v1860_v36 = vld [vmem:[%s6964_s6 + $0x178] sm:$0xff] }
 0x209   : > { %1468 = vmatpush1.bf16.msra.mxu0 %v4422_v31  ;;  %1509 = vmatpush1.bf16.msra.mxu1 %v4424_v35  ;;  %v4434_v31 = vcombine.low %v698_v34, %v698_v34  ;;  %v4436_v35 = vcombine.low %v699_v39, %v699_v39  ;;  %v1856_v34 = vld [vmem:[%s6964_s6 + $0x158] sm:$0xff]  ;;  %v4501_v39 = vcombine.low %v1848_v24, %v1852_v25 }
 0x20a   : > { %4438 = vmatprep.subr.msk.bf16.mxu0 %vm1438_vm15, %v4431_v19  ;;  %4440 = vmatprep.subr.msk.bf16.mxu1 %vm1438_vm15, %v4433_v48  ;;  %v1725_v19 = vadd.f32 %v4458_v26, %v1711_v38  ;;  %v4460_v48 = vsel %vm1733_vm9, 1.0, %v5410_v18  ;;  %v1740_v51 = vadd.f32 %v4461_v50, %v1726_v46  ;;  %v4495_v38 = vcombine.low %v1845_v22, %v1849_v23 }
 0x20b   : > { %v1452_v55 = vsel %vm1438_vm15, %v4434_v31, 0  ;;  %v1458_v37 = vsel %vm1438_vm15, %v4436_v35, 0  ;;  %v4510_v26 = vcombine.high %v1856_v34, %v1860_v36  ;;  %v1864_v35 = vld [vmem:[%s6964_s6 + $0x198] sm:$0x33] }
 0x20c   : > { %v1739_v28 = vadd.f32 %v4460_v48, %v1725_v19  ;;  %v4518_v46 = vcombine.high %v1864_v35, %v1864_v35  ;;  %v4517_v19 = vcombine.low %v1864_v35, %v1864_v35 }
 0x20d   : > { %1470 = vmatpush1.bf16.msra.mxu0 %v1440_v60  ;;  %1511 = vmatpush1.bf16.msra.mxu1 %v1446_v29  ;;  %v4470_v60 = vcombine.high %v1816_v57, %v1820_v58  ;;  %v1821_v29 = vld [vmem:[%s6964_s6 + $0x40] sm:$0xff] }
 0x20e   : > { %1545 = vmatprep.subr.bf16.mxu0 %v4411_v59  ;;  %1586 = vmatprep.subr.bf16.mxu1 %v4413_v62  ;;  %v4908_v42 = vpack.c.bf16 %v1740_v51, %v1739_v28  ;;  %v1825_v59 = vld [vmem:[%s6964_s6 + $0x60] sm:$0xff] }
 0x20f   : > { %v4472_v62 = vcombine.high %v1821_v29, %v1825_v59  ;;  %v4471_v54 = vcombine.low %v1821_v29, %v1825_v59 }
 0x210   : > { %4439 = vmatmul.mubr.msk.bf16.vlgmr.msra.gmra.mrb[4].mxu0 %vm1434_vm6, %v5995_v11  ;;  %4441 = vmatmul.mubr.msk.bf16.vlgmr.msra.gmra.mrb[0].mxu1 %vm1434_vm6, %v5995_v11 }
 0x211   : > { %1546 = vmatpush1.bf16.msra.mxu0 %v4410_v9  ;;  %1587 = vmatpush1.bf16.msra.mxu1 %v4412_v10  ;;  %v1837_v9 = vld [vmem:[%s6964_s6 + $0xc0] sm:$0xff] }
 0x212   : > { %1547 = vmatprep.subr.bf16.mxu0 %v4419_v1  ;;  %1588 = vmatprep.subr.bf16.mxu1 %v4421_v12  ;;  %v1841_v10 = vld [vmem:[%s6964_s6 + $0xe0] sm:$0xff]  ;;  %v4486_v1 = vcombine.high %v1832_v6, %v1836_v8  ;;  %v1840_v12 = vld [vmem:[%s6964_s6 + $0xd8] sm:$0xff]  ;;  %v1838_v6 = vld [vmem:[%s6964_s6 + $0xc8] sm:$0xff] }
 0x213   : > { %1577 = vmatprep.mubr.bf16.mxu0 %v5400_v0  ;;  %1618 = vmatprep.mubr.bf16.mxu1 %v5400_v0  ;;  %v4488_v20 = vcombine.high %v1837_v9, %v1841_v10  ;;  %v4494_v14 = vcombine.high %v1840_v12, %v1844_v4  ;;  %v4487_v27 = vcombine.low %v1837_v9, %v1841_v10  ;;  %v5063_v8 = vld [vmem:[%s6965_s7 + $0x34] ss:$12 sps:$4 sm:$0xff]  }
 0x214   : > { %v4493_v30 = vcombine.low %v1840_v12, %v1844_v4  ;;  %v1850_v12 = vld [vmem:[%s6964_s6 + $0x128] sm:$0xff] }
 0x215   : > { %1548 = vmatpush1.bf16.msra.mxu0 %v4418_v21  ;;  %1589 = vmatpush1.bf16.msra.mxu1 %v4420_v32  ;;  %v4496_v21 = vcombine.high %v1845_v22, %v1849_v23  ;;  %v4502_v32 = vcombine.high %v1848_v24, %v1852_v25  ;;  %v5066_v4 = vld [vmem:[%s6965_s7 + $0x4c] ss:$12 sps:$4 sm:$0xff]   ;;  %v5069_v24 = vld [vmem:[%s6965_s7 + $0x64] ss:$12 sps:$4 sm:$0xff]  }
 0x216   : > { %1549 = vmatprep.subr.bf16.mxu0 %v4427_v15  ;;  %1590 = vmatprep.subr.bf16.mxu1 %v4429_v33  ;;  %v1853_v15 = vld [vmem:[%s6964_s6 + $0x140] sm:$0xff]  ;;  %v1854_v22 = vld [vmem:[%s6964_s6 + $0x148] sm:$0xff] }
 0x217   : > { %v1857_v33 = vld [vmem:[%s6964_s6 + $0x160] sm:$0xff]  ;;  %v1858_v23 = vld [vmem:[%s6964_s6 + $0x168] sm:$0xff] }
 0x218   : > { %v4504_v40 = vcombine.high %v1853_v15, %v1857_v33 }
 0x219   : > { %1550 = vmatpush1.bf16.msra.mxu0 %v4426_v41  ;;  %1591 = vmatpush1.bf16.msra.mxu1 %v4428_v43  ;;  %v4503_v41 = vcombine.low %v1853_v15, %v1857_v33  ;;  %v4509_v43 = vcombine.low %v1856_v34, %v1860_v36  ;;  %v4505_v15 = vcombine.low %v1854_v22, %v1858_v23  ;;  %v5070_v36 = vld [vmem:[%s6965_s7 + $0x78] ss:$12 sps:$4 sm:$0xff]  }
 0x21a   : > { %4442 = vmatprep.subr.msk.bf16.mxu0 %vm1438_vm15, %v4435_v44  ;;  %4444 = vmatprep.subr.msk.bf16.mxu1 %vm1438_vm15, %v4437_v45  ;;  %v1861_v44 = vld [vmem:[%s6964_s6 + $0x180] sm:$0x33] }
 0x21b   : > { %v4512_v45 = vcombine.high %v1861_v44, %v1861_v44  ;;  %v4511_v31 = vcombine.low %v1861_v44, %v1861_v44  ;;  %v1823_v44 = vld [vmem:[%s6964_s6 + $0x50] sm:$0xff] }
 0x21d   : > { %1552 = vmatpush1.bf16.msra.mxu0 %v1452_v55  ;;  %1593 = vmatpush1.bf16.msra.mxu1 %v1458_v37  ;;  %v1814_v55 = vld [vmem:[%s6964_s6 + $0x8] sm:$0xff] }
 0x21e   : > { %4907 = vmatprep.subr.bf16.mxu0 %v5408_v17  ;;  %v1813_v17 = vld [vmem:[%s6964_s6] sm:$0xff]  ;;  %2277 = vmatprep.subr.bf16.mxu1 %v4470_v60  ;;  %v1818_v37 = vld [vmem:[%s6964_s6 + $0x28] sm:$0xff] }
 0x21f   : > { %v4464_v53 = vcombine.high %v1813_v17, %v1817_v52  ;;  %v4466_v28 = vcombine.high %v1814_v55, %v1818_v37  ;;  %v4465_v51 = vcombine.low %v1814_v55, %v1818_v37  ;;  %v1826_v60 = vld [vmem:[%s6964_s6 + $0x68] sm:$0xff]  ;;  %v5081_v55 = vld [vmem:[%s6965_s7 + $0xc4] ss:$12 sps:$4 sm:$0xff]  }
 0x220   : > { %4443 = vmatmul.mubr.msk.bf16.vlgmr.msra.gmra.mrb[8].mxu0 %vm1434_vm6, %v5995_v11  ;;  %4445 = vmatmul.mubr.msk.bf16.vlgmr.msra.gmra.mrb[4].mxu1 %vm1434_vm6, %v5995_v11  ;;  %v4479_v11 = vcombine.low %v1829_v13, %v1833_v5  ;;  %v5058_v5 = vld [vmem:[%s6965_s7 + $0x18] ss:$12 sps:$4 sm:$0xff]  }
 0x221   : > { %4909 = vmatpush3.bf16.msra.mxu0 %v4908_v42  ;;  %4888 = vmatprep.mubr.msk.f32.mxu0 %vm5409_vm1, %v5410_v18  ;;  %v5057_v42 = vld [vmem:[%s6965_s7 + $0x4] ss:$12 sps:$4 sm:$0xff]  }
 0x222   : > { %2309 = vmatprep.mubr.bf16.mxu1 %v5400_v0  ;;  %2154 = vmatprep.subr.bf16.mxu0 %v4464_v53 }
 0x223   : > { %2278 = vmatpush1.bf16.msra.mxu1 %v4469_v47 }
 0x224   : > { %2279 = vmatprep.subr.bf16.mxu1 %v4478_v3 }
 0x227   : > { %2280 = vmatpush1.bf16.msra.mxu1 %v4477_v2  ;;  %v5060_v2 = vld [vmem:[%s6965_s7 + $0x1c] ss:$12 sps:$4 sm:$0xff]  }
 0x228   : > { %4889 = vmatmul.mubr.msk.f32.vlgmr.msra.gmra.mrb[12].mxu0 %vm448_vm0, %v5696_v61  ;;  %v4463_v61 = vcombine.low %v1813_v17, %v1817_v52  ;;  %2281 = vmatprep.subr.bf16.mxu1 %v4486_v1  ;;  %vm2129_vm0 = vcmask 1041408   ;;  %v1846_v1 = vld [vmem:[%s6964_s6 + $0x108] sm:$0xff] }
 0x229   : > { %2186 = vmatprep.mubr.bf16.mxu0 %v5400_v0  ;;  %v2131_v48 = vsel %vm2129_vm0, %v4511_v31, 0  ;;  %v2149_v50 = vsel %vm2129_vm0, %v4517_v19, 0  ;;  %v4497_v25 = vcombine.low %v1846_v1, %v1850_v12  ;;  %v5078_v31 = vld [vmem:[%s6965_s7 + $0xac] ss:$12 sps:$4 sm:$0xff]   ;;  %v5076_v19 = vld [vmem:[%s6965_s7 + $0xa8] ss:$12 sps:$4 sm:$0xff]  }
 0x22a   : > { %2155 = vmatpush1.bf16.msra.mxu0 %v4463_v61  ;;  %v1822_v61 = vld [vmem:[%s6964_s6 + $0x48] sm:$0xff] }
 0x22b   : > { %2156 = vmatprep.subr.bf16.mxu0 %v4472_v62  ;;  %2282 = vmatpush1.bf16.msra.mxu1 %v4485_v16  ;;  %v4474_v62 = vcombine.high %v1822_v61, %v1826_v60  ;;  %v4473_v3 = vcombine.low %v1822_v61, %v1826_v60  ;;  %v5084_v61 = vld [vmem:[%s6965_s7 + $0xd8] ss:$12 sps:$4 sm:$0xff]   ;;  %v1847_v60 = vld [vmem:[%s6964_s6 + $0x110] sm:$0xff] }
 0x22c   : > { %2283 = vmatprep.subr.bf16.mxu1 %v4494_v14  ;;  %v5064_v14 = vld [vmem:[%s6965_s7 + $0x48] ss:$12 sps:$4 sm:$0xff]  }
 0x22e   : > { %2157 = vmatpush1.bf16.msra.mxu0 %v4471_v54  ;;  %v1834_v54 = vld [vmem:[%s6964_s6 + $0xa8] sm:$0xff] }
 0x22f   : > { %2158 = vmatprep.subr.bf16.mxu0 %v4480_v7  ;;  %2284 = vmatpush1.bf16.msra.mxu1 %v4493_v30  ;;  %v4482_v13 = vcombine.high %v1830_v56, %v1834_v54  ;;  %v1842_v7 = vld [vmem:[%s6964_s6 + $0xe8] sm:$0xff]  ;;  %v4481_v9 = vcombine.low %v1830_v56, %v1834_v54  ;;  %v5089_v56 = vld [vmem:[%s6965_s7 + $0xf0] ss:$12 sps:$4 sm:$0xff]  }
 0x230   : > { %2285 = vmatprep.subr.bf16.mxu1 %v4502_v32  ;;  %v4490_v10 = vcombine.high %v1838_v6, %v1842_v7  ;;  %v4489_v16 = vcombine.low %v1838_v6, %v1842_v7  ;;  %v5067_v30 = vld [vmem:[%s6965_s7 + $0x60] ss:$12 sps:$4 sm:$0xff]   ;;  %v5072_v32 = vld [vmem:[%s6965_s7 + $0x7c] ss:$12 sps:$4 sm:$0xff]   ;;  %v1855_v54 = vld [vmem:[%s6964_s6 + $0x150] sm:$0xff] }
 0x231   : > { %v5094_v6 = vld [vmem:[%s6965_s7 + $0x108] ss:$12 sps:$4 sm:$0xff]  }
 0x232   : > { %2159 = vmatpush1.bf16.msra.mxu0 %v4479_v11  ;;  %v5061_v11 = vld [vmem:[%s6965_s7 + $0x30] ss:$12 sps:$4 sm:$0xff]  }
 0x233   : > { %2160 = vmatprep.subr.bf16.mxu0 %v4488_v20  ;;  %2286 = vmatpush1.bf16.msra.mxu1 %v4501_v39  ;;  %v4498_v20 = vcombine.high %v1846_v1, %v1850_v12  ;;  %v1819_v39 = vld [vmem:[%s6964_s6 + $0x30] sm:$0xff]  ;;  %v5099_v1 = vld [vmem:[%s6965_s7 + $0x120] ss:$12 sps:$4 sm:$0xff]   ;;  %v5106_v12 = vld [vmem:[%s6965_s7 + $0x13c] ss:$12 sps:$4 sm:$0xff]  }
 0x234   : > { %2287 = vmatprep.subr.bf16.mxu1 %v4510_v26  ;;  %v1863_v7 = vld [vmem:[%s6964_s6 + $0x190] sm:$0x33] }
 0x236   : > { %2161 = vmatpush1.bf16.msra.mxu0 %v4487_v27  ;;  %v4506_v27 = vcombine.high %v1854_v22, %v1858_v23  ;;  %v5083_v22 = vld [vmem:[%s6965_s7 + $0x8] ss:$12 sps:$4 sm:$0xff]   ;;  %v5087_v23 = vld [vmem:[%s6965_s7 + $0xe0] ss:$12 sps:$4 sm:$0xff]  }
 0x237   : > { %2162 = vmatprep.subr.bf16.mxu0 %v4496_v21  ;;  %2288 = vmatpush1.bf16.msra.mxu1 %v4509_v43  ;;  %v1862_v21 = vld [vmem:[%s6964_s6 + $0x188] sm:$0x33]  ;;  %v5073_v43 = vld [vmem:[%s6965_s7 + $0x90] ss:$12 sps:$4 sm:$0xff]  }
 0x238   : > { %4525 = vmatprep.subr.msk.bf16.mxu1 %vm2129_vm0, %v4518_v46  ;;  %v4514_v33 = vcombine.high %v1862_v21, %v1862_v21  ;;  %v4513_v34 = vcombine.low %v1862_v21, %v1862_v21  ;;  %v5098_v21 = vld [vmem:[%s6965_s7 + $0x50] ss:$12 sps:$4 sm:$0xff]  }
 0x23a   : > { %2163 = vmatpush1.bf16.msra.mxu0 %v4495_v38  ;;  %v1815_v38 = vld [vmem:[%s6964_s6 + $0x10] sm:$0xff]  ;;  %v2137_v26 = vsel %vm2129_vm0, %v4513_v34, 0  ;;  %v5108_v34 = vld [vmem:[%s6965_s7 + $0x80] ss:$12 sps:$4 sm:$0xff]  }
 0x23b   : > { %2164 = vmatprep.subr.bf16.mxu0 %v4504_v40  ;;  %2290 = vmatpush1.bf16.msra.mxu1 %v2149_v50  ;;  %v5075_v40 = vld [vmem:[%s6965_s7 + $0x94] ss:$12 sps:$4 sm:$0xff]   ;;  %v4467_v35 = vcombine.low %v1815_v38, %v1819_v39 }
 0x23c   : > { %3631 = vmatprep.subr.bf16.mxu1 %v5057_v42  ;;  %v1835_v50 = vld [vmem:[%s6964_s6 + $0xb0] sm:$0xff] }
 0x23d   : > { %v1839_v42 = vld [vmem:[%s6964_s6 + $0xd0] sm:$0xff] }
 0x23e   : > { %2165 = vmatpush1.bf16.msra.mxu0 %v4503_v41  ;;  %v4468_v41 = vcombine.high %v1815_v38, %v1819_v39  ;;  %v5113_v38 = vld [vmem:[%s6965_s7 + $0x98] ss:$12 sps:$4 sm:$0xff]  }
 0x23f   : > { %4519 = vmatprep.subr.msk.bf16.mxu0 %vm2129_vm0, %v4512_v45  ;;  %v1827_v45 = vld [vmem:[%s6964_s6 + $0x70] sm:$0xff]  ;;  %v5116_v39 = vld [vmem:[%s6965_s7 + $0x16c] ss:$12 sps:$4 sm:$0xff]  }
 0x240   : > { %v4476_v46 = vcombine.high %v1823_v44, %v1827_v45  ;;  %v4475_v37 = vcombine.low %v1823_v44, %v1827_v45  ;;  %v5122_v44 = vld [vmem:[%s6965_s7 + $0x248] ss:$12 sps:$4 sm:$0xff]  }
 0x242   : > { %2167 = vmatpush1.bf16.msra.mxu0 %v2131_v48  ;;  %v1831_v48 = vld [vmem:[%s6964_s6 + $0x90] sm:$0xff] }
 0x243   : > { %2195 = vmatprep.subr.bf16.mxu0 %v4466_v28  ;;  %v4484_v28 = vcombine.high %v1831_v48, %v1835_v50 }
 0x2e3   : > { %v6146_v17 = vpop.f32.mrb[0].mxu1 }
 0x2e4   : > { %v6148_v52 = vpop.f32.mrb[1].mxu1 }
 0x2e5   : > { %v1542_v53 = vpop.f32.mrb[2].mxu1 }
 0x2e6   : > { %v1543_v57 = vpop.f32.mrb[3].mxu1  ;;  %v1843_v53 = vld [vmem:[%s6964_s6 + $0xf0] sm:$0xff] }
 0x2e7   : > { %v4483_v57 = vcombine.low %v1831_v48, %v1835_v50 }
 0x2fb   : > { %v1807_v58 = vpop.f32.mrb[12].mxu0 }
 0x2fc   : > { %v1811_v47 = vmul.f32 0.125, %v1807_v58  ;;  %v4890_v29 = vpop.f32.mrb[13].mxu0  ;;  %v4492_v58 = vcombine.high %v1839_v42, %v1843_v53 }
 0x2fd   : > { %v5091_v29 = vld [vmem:[%s6965_s7 + $0xf4] ss:$12 sps:$4 sm:$0xff]  }
 0x2fe   : > { %v6156_v59 = vpack.c.bf16 %v1811_v47, %v1811_v47  ;;  %v1851_v47 = vld [vmem:[%s6964_s6 + $0x130] sm:$0xff] }
 0x300   : > { %4520 = vmatmul.mubr.msk.bf16.vlgmr.msra.gmra.mrb[4].mxu0 %vm2125_vm11, %v6156_v59  ;;  %4526 = vmatmul.mubr.msk.bf16.vlgmr.msra.gmra.mrb[4].mxu1 %vm2125_vm11, %v6156_v59 }
 0x301   : > { %2196 = vmatpush1.bf16.msra.mxu0 %v4465_v51  ;;  %2227 = vmatprep.mubr.bf16.mxu0 %v5400_v0  ;;  %v5079_v51 = vld [vmem:[%s6965_s7 + $0xc0] ss:$12 sps:$4 sm:$0xff]  }
 0x302   : > { %2197 = vmatprep.subr.bf16.mxu0 %v4474_v62  ;;  %3632 = vmatpush1.bf16.msra.mxu1 %v5055_v63  ;;  %v4491_v62 = vcombine.low %v1839_v42, %v1843_v53  ;;  %v4500_v63 = vcombine.high %v1847_v60, %v1851_v47  ;;  %v5126_v53 = vld [vmem:[%s6965_s7 + $0x19c] ss:$12 sps:$4 sm:$0xff]  }
 0x303   : > { %3633 = vmatprep.subr.bf16.mxu1 %v5060_v2  ;;  %v1859_v2 = vld [vmem:[%s6964_s6 + $0x170] sm:$0xff] }
 0x305   : > { %2198 = vmatpush1.bf16.msra.mxu0 %v4473_v3  ;;  %v5096_v3 = vld [vmem:[%s6965_s7 + $0x10c] ss:$12 sps:$4 sm:$0xff]  }
 0x306   : > { %2199 = vmatprep.subr.bf16.mxu0 %v4482_v13  ;;  %3634 = vmatpush1.bf16.msra.mxu1 %v5058_v5  ;;  %v4499_v13 = vcombine.low %v1847_v60, %v1851_v47  ;;  %v4508_v5 = vcombine.high %v1855_v54, %v1859_v2  ;;  %v5132_v60 = vld [vmem:[%s6965_s7 + $0x278] ss:$12 sps:$4 sm:$0xff]   ;;  %v5129_v47 = vld [vmem:[%s6965_s7 + $0x1b0] ss:$12 sps:$4 sm:$0xff]  }
 0x307   : > { %3635 = vmatprep.subr.bf16.mxu1 %v5063_v8  ;;  %v5101_v8 = vld [vmem:[%s6965_s7 + $0x124] ss:$12 sps:$4 sm:$0xff]  }
 0x309   : > { %2200 = vmatpush1.bf16.msra.mxu0 %v4481_v9  ;;  %v4507_v9 = vcombine.low %v1855_v54, %v1859_v2  ;;  %v5138_v54 = vld [vmem:[%s6965_s7 + $0x1d0] ss:$12 sps:$4 sm:$0xff]  }
 0x30a   : > { %2201 = vmatprep.subr.bf16.mxu0 %v4490_v10  ;;  %3636 = vmatpush1.bf16.msra.mxu1 %v5061_v11  ;;  %v4516_v10 = vcombine.high %v1863_v7, %v1863_v7  ;;  %v4515_v11 = vcombine.low %v1863_v7, %v1863_v7  ;;  %v5141_v2 = vld [vmem:[%s6965_s7 + $0x1e4] ss:$12 sps:$4 sm:$0xff]   ;;  %v5147_v7 = vld [vmem:[%s6965_s7 + $0x2c0] ss:$12 sps:$4 sm:$0xff]  }
 0x30b   : > { %3637 = vmatprep.subr.bf16.mxu1 %v5066_v4 }
 0x30c   : > { %v2143_v4 = vsel %vm2129_vm0, %v4515_v11, 0  ;;  %v5152_v11 = vld [vmem:[%s6965_s7 + $0x2d8] ss:$12 sps:$4 sm:$0xff]  }
 0x30d   : > { %2202 = vmatpush1.bf16.msra.mxu0 %v4489_v16  ;;  %v5082_v16 = vld [vmem:[%s6965_s7 + $0xc8] ss:$12 sps:$4 sm:$0xff]  }
 0x30e   : > { %2203 = vmatprep.subr.bf16.mxu0 %v4498_v20  ;;  %3638 = vmatpush1.bf16.msra.mxu1 %v5064_v14  ;;  %v5104_v20 = vld [vmem:[%s6965_s7 + $0x138] ss:$12 sps:$4 sm:$0xff]   ;;  %v5111_v14 = vld [vmem:[%s6965_s7 + $0x154] ss:$12 sps:$4 sm:$0xff]  }
 0x30f   : > { %3639 = vmatprep.subr.bf16.mxu1 %v5069_v24  ;;  %v5109_v24 = vld [vmem:[%s6965_s7 + $0x150] ss:$12 sps:$4 sm:$0xff]  }
 0x311   : > { %2204 = vmatpush1.bf16.msra.mxu0 %v4497_v25  ;;  %v5088_v25 = vld [vmem:[%s6965_s7 + $0x20] ss:$12 sps:$4 sm:$0xff]  }
 0x312   : > { %2205 = vmatprep.subr.bf16.mxu0 %v4506_v27  ;;  %3640 = vmatpush1.bf16.msra.mxu1 %v5067_v30  ;;  %v5092_v27 = vld [vmem:[%s6965_s7 + $0xf8] ss:$12 sps:$4 sm:$0xff]  }
 0x313   : > { %3641 = vmatprep.subr.bf16.mxu1 %v5072_v32  ;;  %v5093_v30 = vld [vmem:[%s6965_s7 + $0x38] ss:$12 sps:$4 sm:$0xff]   ;;  %v5102_v32 = vld [vmem:[%s6965_s7 + $0x128] ss:$12 sps:$4 sm:$0xff]  }
 0x315   : > { %2206 = vmatpush1.bf16.msra.mxu0 %v4505_v15  ;;  %v5103_v15 = vld [vmem:[%s6965_s7 + $0x68] ss:$12 sps:$4 sm:$0xff]  }
 0x316   : > { %4521 = vmatprep.subr.msk.bf16.mxu0 %vm2129_vm0, %v4514_v33  ;;  %3642 = vmatpush1.bf16.msra.mxu1 %v5070_v36  ;;  %v5107_v33 = vld [vmem:[%s6965_s7 + $0x140] ss:$12 sps:$4 sm:$0xff]   ;;  %v5112_v36 = vld [vmem:[%s6965_s7 + $0x158] ss:$12 sps:$4 sm:$0xff]  }
 0x317   : > { %3643 = vmatprep.subr.bf16.mxu1 %v5075_v40  ;;  %v5117_v40 = vld [vmem:[%s6965_s7 + $0x170] ss:$12 sps:$4 sm:$0xff]  }
 0x319   : > { %2208 = vmatpush1.bf16.msra.mxu0 %v2137_v26  ;;  %v5114_v26 = vld [vmem:[%s6965_s7 + $0x168] ss:$12 sps:$4 sm:$0xff]  }
 0x31a   : > { %2236 = vmatprep.subr.bf16.mxu0 %v4468_v41  ;;  %3644 = vmatpush1.bf16.msra.mxu1 %v5073_v43  ;;  %v5118_v41 = vld [vmem:[%s6965_s7 + $0xb0] ss:$12 sps:$4 sm:$0xff]  }
 0x31b   : > { %3645 = vmatprep.subr.bf16.mxu1 %v5078_v31  ;;  %v5121_v43 = vld [vmem:[%s6965_s7 + $0x184] ss:$12 sps:$4 sm:$0xff]  }
 0x31c   : > { %4522 = vmatmul.mubr.msk.bf16.vlgmr.msra.gmra.mrb[16].mxu0 %vm2125_vm11, %v6156_v59 }
 0x31d   : > { %2237 = vmatpush1.bf16.msra.mxu0 %v4467_v35  ;;  %2268 = vmatprep.mubr.bf16.mxu0 %v5400_v0  ;;  %v5086_v0 = vld [vmem:[%s6965_s7 + $0xdc] ss:$12 sps:$4 sm:$0xff]  }
 0x31e   : > { %2238 = vmatprep.subr.bf16.mxu0 %v4476_v46  ;;  %3646 = vmatpush1.bf16.msra.mxu1 %v5076_v19 }
 0x31f   : > { %3647 = vmatprep.subr.bf16.mxu1 %v5081_v55  ;;  %v5119_v55 = vld [vmem:[%s6965_s7 + $0x180] ss:$12 sps:$4 sm:$0xff]  }
 0x321   : > { %2239 = vmatpush1.bf16.msra.mxu0 %v4475_v37  ;;  %v5123_v37 = vld [vmem:[%s6965_s7 + $0x188] ss:$12 sps:$4 sm:$0xff]  }
 0x322   : > { %2240 = vmatprep.subr.bf16.mxu0 %v4484_v28  ;;  %3648 = vmatpush1.bf16.msra.mxu1 %v5079_v51 }
 0x323   : > { %3649 = vmatprep.subr.bf16.mxu1 %v5086_v0  ;;  %v5127_v0 = vld [vmem:[%s6965_s7 + $0x260] ss:$12 sps:$4 sm:$0xff]  }
 0x325   : > { %2241 = vmatpush1.bf16.msra.mxu0 %v4483_v57  ;;  %v5124_v57 = vld [vmem:[%s6965_s7 + $0x198] ss:$12 sps:$4 sm:$0xff]  }
 0x326   : > { %2242 = vmatprep.subr.bf16.mxu0 %v4492_v58  ;;  %3650 = vmatpush1.bf16.msra.mxu1 %v5084_v61  ;;  %v5128_v58 = vld [vmem:[%s6965_s7 + $0x1a0] ss:$12 sps:$4 sm:$0xff]  }
 0x327   : > { %3651 = vmatprep.subr.bf16.mxu1 %v5091_v29  ;;  %v5131_v61 = vld [vmem:[%s6965_s7 + $0x1b4] ss:$12 sps:$4 sm:$0xff]   ;;  %v5133_v29 = vld [vmem:[%s6965_s7 + $0x1b8] ss:$12 sps:$4 sm:$0xff]  }
 0x329   : > { %2243 = vmatpush1.bf16.msra.mxu0 %v4491_v62  ;;  %v5136_v62 = vld [vmem:[%s6965_s7 + $0x1cc] ss:$12 sps:$4 sm:$0xff]  }
 0x32a   : > { %2244 = vmatprep.subr.bf16.mxu0 %v4500_v63  ;;  %3652 = vmatpush1.bf16.msra.mxu1 %v5089_v56  ;;  %v5137_v63 = vld [vmem:[%s6965_s7 + $0x290] ss:$12 sps:$4 sm:$0xff]   ;;  %v5134_v56 = vld [vmem:[%s6965_s7 + $0x1c8] ss:$12 sps:$4 sm:$0xff]  }
 0x32b   : > { %3653 = vmatprep.subr.bf16.mxu1 %v5096_v3  ;;  %v5142_v3 = vld [vmem:[%s6965_s7 + $0x2a8] ss:$12 sps:$4 sm:$0xff]  }
 0x32d   : > { %2245 = vmatpush1.bf16.msra.mxu0 %v4499_v13  ;;  %v5139_v13 = vld [vmem:[%s6965_s7 + $0x1e0] ss:$12 sps:$4 sm:$0xff]  }
 0x32e   : > { %2246 = vmatprep.subr.bf16.mxu0 %v4508_v5  ;;  %3654 = vmatpush1.bf16.msra.mxu1 %v5094_v6  ;;  %v5143_v5 = vld [vmem:[%s6965_s7 + $0x1e8] ss:$12 sps:$4 sm:$0xff]  }
 0x32f   : > { %3655 = vmatprep.subr.bf16.mxu1 %v5101_v8  ;;  %v5146_v6 = vld [vmem:[%s6965_s7 + $0x1fc] ss:$12 sps:$4 sm:$0xff]   ;;  %v5144_v8 = vld [vmem:[%s6965_s7 + $0x1f8] ss:$12 sps:$4 sm:$0xff]  }
 0x331   : > { %2247 = vmatpush1.bf16.msra.mxu0 %v4507_v9  ;;  %v5148_v9 = vld [vmem:[%s6965_s7 + $0x200] ss:$12 sps:$4 sm:$0xff]  }
 0x332   : > { %4523 = vmatprep.subr.msk.bf16.mxu0 %vm2129_vm0, %v4516_v10  ;;  %3656 = vmatpush1.bf16.msra.mxu1 %v5099_v1  ;;  %v5151_v10 = vld [vmem:[%s6965_s7 + $0x214] ss:$12 sps:$4 sm:$0xff]   ;;  %v5149_v1 = vld [vmem:[%s6965_s7 + $0x210] ss:$12 sps:$4 sm:$0xff]  }
 0x333   : > { %3657 = vmatprep.subr.bf16.mxu1 %v5106_v12  ;;  %v5153_v12 = vld [vmem:[%s6965_s7 + $0x218] ss:$12 sps:$4 sm:$0xff]  }
 0x335   : > { %2249 = vmatpush1.bf16.msra.mxu0 %v2143_v4  ;;  %v5156_v4 = vld [vmem:[%s6965_s7 + $0x22c] ss:$12 sps:$4 sm:$0xff]  }
 0x336   : > { %4756 = vmatprep.subr.bf16.mxu0 %v5082_v16  ;;  %3658 = vmatpush1.bf16.msra.mxu1 %v5104_v20  ;;  %v5157_v16 = vld [vmem:[%s6965_s7 + $0x2f0] ss:$12 sps:$4 sm:$0xff]  }
 0x337   : > { %3659 = vmatprep.subr.bf16.mxu1 %v5111_v14 }
 0x338   : > { %4524 = vmatmul.mubr.msk.bf16.vlgmr.msra.gmra.mrb[8].mxu0 %vm2125_vm11, %v6156_v59  ;;  %v5097_v59 = vld [vmem:[%s6965_s7 + $0x110] ss:$12 sps:$4 sm:$0xff]  }
 0x339   : > { %4757 = vmatpush3.bf16.msra.mxu0 %v5083_v22 }
 0x33a   : > { %4758 = vmatprep.subr.bf16.mxu0 %v5087_v23  ;;  %3660 = vmatpush1.bf16.msra.mxu1 %v5109_v24 }
 0x33b   : > { %3661 = vmatprep.subr.bf16.mxu1 %v5116_v39  ;;  %v5171_v39 = vld [vmem:[%s6965_s7 + $0x274] ss:$12 sps:$4 sm:$0xff]  }
 0x33d   : > { %4759 = vmatpush3.bf16.msra.mxu0 %v5088_v25  ;;  %v5154_v25 = vld [vmem:[%s6965_s7 + $0x228] ss:$12 sps:$4 sm:$0xff]  }
 0x33e   : > { %4760 = vmatprep.subr.bf16.mxu0 %v5092_v27  ;;  %3662 = vmatpush1.bf16.msra.mxu1 %v5114_v26  ;;  %v5169_v26 = vld [vmem:[%s6965_s7 + $0x270] ss:$12 sps:$4 sm:$0xff]  }
 0x33f   : > { %3672 = vmatprep.subr.bf16.mxu1 %v5121_v43  ;;  %v5176_v43 = vld [vmem:[%s6965_s7 + $0x28c] ss:$12 sps:$4 sm:$0xff]  }
 0x341   : > { %4761 = vmatpush3.bf16.msra.mxu0 %v5093_v30  ;;  %v5158_v30 = vld [vmem:[%s6965_s7 + $0x230] ss:$12 sps:$4 sm:$0xff]  }
 0x342   : > { %4762 = vmatprep.subr.bf16.mxu0 %v5097_v59 }
 0x345   : > { %4763 = vmatpush3.bf16.msra.mxu0 %v5098_v21  ;;  %v5159_v21 = vld [vmem:[%s6965_s7 + $0x240] ss:$12 sps:$4 sm:$0xff]  }
 0x346   : > { %4764 = vmatprep.subr.bf16.mxu0 %v5102_v32  ;;  %v5163_v32 = vld [vmem:[%s6965_s7 + $0x308] ss:$12 sps:$4 sm:$0xff]  }
 0x349   : > { %4765 = vmatpush3.bf16.msra.mxu0 %v5103_v15  ;;  %v5166_v15 = vld [vmem:[%s6965_s7 + $0x25c] ss:$12 sps:$4 sm:$0xff]  }
 0x34a   : > { %4766 = vmatprep.subr.bf16.mxu0 %v5107_v33 }
 0x34d   : > { %4767 = vmatpush3.bf16.msra.mxu0 %v5108_v34  ;;  %v5167_v34 = vld [vmem:[%s6965_s7 + $0x3e0] ss:$12 sps:$4 sm:$0xff]  }
 0x34e   : > { %4768 = vmatprep.subr.bf16.mxu0 %v5112_v36  ;;  %v5164_v36 = vld [vmem:[%s6965_s7 + $0x258] ss:$12 sps:$4 sm:$0xff]  }
 0x351   : > { %4769 = vmatpush3.bf16.msra.mxu0 %v5113_v38  ;;  %v5168_v38 = vld [vmem:[%s6965_s7 + $0x320] ss:$12 sps:$4 sm:$0xff]  }
 0x352   : > { %4770 = vmatprep.subr.bf16.mxu0 %v5117_v40  ;;  %v5172_v40 = vld [vmem:[%s6965_s7 + $0x3f8] ss:$12 sps:$4 sm:$0xff]  }
 0x355   : > { %4771 = vmatpush3.bf16.msra.mxu0 %v5118_v41  ;;  %v5173_v41 = vld [vmem:[%s6965_s7 + $0x338] ss:$12 sps:$4 sm:$0xff]  }
 0x356   : > { %4778 = vmatprep.subr.bf16.mxu0 %v5122_v44  ;;  %v5177_v44 = vld [vmem:[%s6965_s7 + $0x410] ss:$12 sps:$4 sm:$0xff]  }
 0x3d3   : > { %v2188_v45 = vpop.f32.mrb[4].mxu0  ;;  %v6385_v31 = vpop.f32.mrb[4].mxu1 }
 0x3d4   : > { %v2190_v35 = vpop.f32.mrb[5].mxu0  ;;  %v6387_v46 = vpop.f32.mrb[5].mxu1  ;;  %v2326_v28 = vpack.c.bf16 %v2188_v45, %v2188_v45  ;;  %v5174_v45 = vld [vmem:[%s6965_s7 + $0x288] ss:$12 sps:$4 sm:$0xff]  }
 0x3d5   : > { %v2327_v19 = vpack.c.bf16 %v2190_v35, %v2190_v35  ;;  %v2192_v48 = vpop.f32.mrb[6].mxu0  ;;  %v2315_v50 = vpop.f32.mrb[6].mxu1  ;;  %v5178_v35 = vld [vmem:[%s6965_s7 + $0x350] ss:$12 sps:$4 sm:$0xff]  }
 0x3d6   : > { %v2193_v51 = vpop.f32.mrb[7].mxu0  ;;  %v2316_v42 = vpop.f32.mrb[7].mxu1  ;;  %v5182_v48 = vld [vmem:[%s6965_s7 + $0x428] ss:$12 sps:$4 sm:$0xff]   ;;  %v5179_v50 = vld [vmem:[%s6965_s7 + $0x2a0] ss:$12 sps:$4 sm:$0xff]  }
 0x3d7   : > { %3663 = vmatprep.mubr.bf16.mxu1 %v2327_v19  ;;  %3827 = vmatprep.mubr.bf16.mxu0 %v2327_v19  ;;  %v5181_v19 = vld [vmem:[%s6965_s7 + $0x2a4] ss:$12 sps:$4 sm:$0xff]   ;;  %v5188_v42 = vld [vmem:[%s6965_s7 + $0x380] ss:$12 sps:$4 sm:$0xff]  }
 0x3d8   : > { %3664 = vmatmul.mubr.bf16.vlgmr.msra.gmra.mrb[8].mxu1 %v2326_v28  ;;  %3828 = vmatmul.mubr.bf16.vlgmr.msra.gmra.mrb[20].mxu0 %v2326_v28  ;;  %v5187_v28 = vld [vmem:[%s6965_s7 + $0x440] ss:$12 sps:$4 sm:$0xff]   ;;  %v5184_v51 = vld [vmem:[%s6965_s7 + $0x2b8] ss:$12 sps:$4 sm:$0xff]  }
 0x3d9   : > { %3673 = vmatpush1.bf16.msra.mxu1 %v5119_v55  ;;  %4779 = vmatpush3.bf16.msra.mxu0 %v5123_v37  ;;  %v5183_v55 = vld [vmem:[%s6965_s7 + $0x368] ss:$12 sps:$4 sm:$0xff]  }
 0x3da   : > { %3674 = vmatprep.subr.bf16.mxu1 %v5126_v53  ;;  %4780 = vmatprep.subr.bf16.mxu0 %v5127_v0  ;;  %v5186_v37 = vld [vmem:[%s6965_s7 + $0x2bc] ss:$12 sps:$4 sm:$0xff]   ;;  %v5191_v53 = vld [vmem:[%s6965_s7 + $0x2d4] ss:$12 sps:$4 sm:$0xff]  }
 0x3dd   : > { %3675 = vmatpush1.bf16.msra.mxu1 %v5124_v57  ;;  %4781 = vmatpush3.bf16.msra.mxu0 %v5128_v58  ;;  %v5192_v57 = vld [vmem:[%s6965_s7 + $0x458] ss:$12 sps:$4 sm:$0xff]  }
 0x3de   : > { %3676 = vmatprep.subr.bf16.mxu1 %v5131_v61  ;;  %4782 = vmatprep.subr.bf16.mxu0 %v5132_v60 }
 0x3e1   : > { %3677 = vmatpush1.bf16.msra.mxu1 %v5129_v47  ;;  %4783 = vmatpush3.bf16.msra.mxu0 %v5133_v29  ;;  %v5189_v47 = vld [vmem:[%s6965_s7 + $0x2d0] ss:$12 sps:$4 sm:$0xff]  }
 0x3e2   : > { %3678 = vmatprep.subr.bf16.mxu1 %v5136_v62  ;;  %4784 = vmatprep.subr.bf16.mxu0 %v5137_v63  ;;  %v5193_v62 = vld [vmem:[%s6965_s7 + $0x398] ss:$12 sps:$4 sm:$0xff]  }
 0x3e3   : > { %v5196_v63 = vld [vmem:[%s6965_s7 + $0x2ec] ss:$12 sps:$4 sm:$0xff]  }
 0x3e5   : > { %3679 = vmatpush1.bf16.msra.mxu1 %v5134_v56  ;;  %4785 = vmatpush3.bf16.msra.mxu0 %v5138_v54  ;;  %v5197_v56 = vld [vmem:[%s6965_s7 + $0x470] ss:$12 sps:$4 sm:$0xff]   ;;  %v5194_v54 = vld [vmem:[%s6965_s7 + $0x2e8] ss:$12 sps:$4 sm:$0xff]  }
 0x3e6   : > { %3680 = vmatprep.subr.bf16.mxu1 %v5141_v2  ;;  %4786 = vmatprep.subr.bf16.mxu0 %v5142_v3  ;;  %v5198_v2 = vld [vmem:[%s6965_s7 + $0x3b0] ss:$12 sps:$4 sm:$0xff]  }
 0x3e7   : > { %v5201_v3 = vld [vmem:[%s6965_s7 + $0x304] ss:$12 sps:$4 sm:$0xff]  }
 0x3e9   : > { %3681 = vmatpush1.bf16.msra.mxu1 %v5139_v13  ;;  %4787 = vmatpush3.bf16.msra.mxu0 %v5143_v5  ;;  %v5202_v13 = vld [vmem:[%s6965_s7 + $0x548] ss:$12 sps:$4 sm:$0xff]   ;;  %v5199_v5 = vld [vmem:[%s6965_s7 + $0x300] ss:$12 sps:$4 sm:$0xff]  }
 0x3ea   : > { %3682 = vmatprep.subr.bf16.mxu1 %v5146_v6  ;;  %4788 = vmatprep.subr.bf16.mxu0 %v5147_v7  ;;  %v5203_v6 = vld [vmem:[%s6965_s7 + $0x488] ss:$12 sps:$4 sm:$0xff]  }
 0x3ed   : > { %3683 = vmatpush1.bf16.msra.mxu1 %v5144_v8  ;;  %4789 = vmatpush3.bf16.msra.mxu0 %v5148_v9  ;;  %v5206_v8 = vld [vmem:[%s6965_s7 + $0x31c] ss:$12 sps:$4 sm:$0xff]   ;;  %v5207_v9 = vld [vmem:[%s6965_s7 + $0x560] ss:$12 sps:$4 sm:$0xff]  }
 0x3ee   : > { %3684 = vmatprep.subr.bf16.mxu1 %v5151_v10  ;;  %4790 = vmatprep.subr.bf16.mxu0 %v5152_v11  ;;  %v6603_v10 = vpack.c.bf16 %v6387_v46, %v6387_v46  ;;  %v5204_v11 = vld [vmem:[%s6965_s7 + $0x318] ss:$12 sps:$4 sm:$0xff]  }
 0x3ef   : > { %v2229_v20 = vpop.f32.mrb[16].mxu0  ;;  %v5212_v46 = vld [vmem:[%s6965_s7 + $0x578] ss:$12 sps:$4 sm:$0xff]  }
 0x3f0   : > { %v4910_v14 = vadd.f32 %v2229_v20, %v6146_v17  ;;  %v2231_v22 = vpop.f32.mrb[17].mxu0  ;;  %v5161_v17 = vld [vmem:[%s6965_s7 + $0x244] ss:$12 sps:$4 sm:$0xff]   ;;  %v5216_v20 = vld [vmem:[%s6965_s7 + $0x34c] ss:$12 sps:$4 sm:$0xff]  }
 0x3f1   : > { %v4911_v23 = vadd.f32 %v2231_v22, %v6148_v52  ;;  %v2233_v24 = vpop.f32.mrb[18].mxu0  ;;  %3685 = vmatpush1.bf16.msra.mxu1 %v5149_v1  ;;  %4791 = vmatpush3.bf16.msra.mxu0 %v5153_v12  ;;  %v5162_v52 = vld [vmem:[%s6965_s7 + $0x3c8] ss:$12 sps:$4 sm:$0xff]   ;;  %v5208_v1 = vld [vmem:[%s6965_s7 + $0x4a0] ss:$12 sps:$4 sm:$0xff]  }
 0x3f2   : > { %v2234_v27 = vpop.f32.mrb[19].mxu0  ;;  %3686 = vmatprep.subr.bf16.mxu1 %v5156_v4  ;;  %4792 = vmatprep.subr.bf16.mxu0 %v5157_v16  ;;  %v6496_v33 = vpack.c.bf16 %v4910_v14, %v4910_v14  ;;  %v5211_v12 = vld [vmem:[%s6965_s7 + $0x334] ss:$12 sps:$4 sm:$0xff]   ;;  %v5209_v4 = vld [vmem:[%s6965_s7 + $0x330] ss:$12 sps:$4 sm:$0xff]  }
 0x3f3   : > { %v2329_v59 = vpack.c.bf16 %v4911_v23, %v4911_v23  ;;  %v5213_v16 = vld [vmem:[%s6965_s7 + $0x4b8] ss:$12 sps:$4 sm:$0xff]   ;;  %v5217_v14 = vld [vmem:[%s6965_s7 + $0x590] ss:$12 sps:$4 sm:$0xff]   ;;  %v5214_v22 = vld [vmem:[%s6965_s7 + $0x348] ss:$12 sps:$4 sm:$0xff]  }
 0x3f4   : > { %v5218_v23 = vld [vmem:[%s6965_s7 + $0x4d0] ss:$12 sps:$4 sm:$0xff]   ;;  %v5219_v27 = vld [vmem:[%s6965_s7 + $0x360] ss:$12 sps:$4 sm:$0xff]  }
 0x3f5   : > { %3687 = vmatpush1.bf16.msra.mxu1 %v5154_v25  ;;  %3704 = vmatprep.mubr.bf16.mxu1 %v2329_v59  ;;  %v5221_v24 = vld [vmem:[%s6965_s7 + $0x364] ss:$12 sps:$4 sm:$0xff]   ;;  %v5222_v25 = vld [vmem:[%s6965_s7 + $0x5a8] ss:$12 sps:$4 sm:$0xff]  }
 0x3f6   : > { %4793 = vmatpush3.bf16.msra.mxu0 %v5158_v30  ;;  %3867 = vmatprep.mubr.bf16.mxu0 %v2329_v59  ;;  %v5223_v30 = vld [vmem:[%s6965_s7 + $0x4e8] ss:$12 sps:$4 sm:$0xff]  }
 0x3f7   : > { %3688 = vmatprep.subr.bf16.mxu1 %v5161_v17  ;;  %4800 = vmatprep.subr.bf16.mxu0 %v5162_v52  ;;  %v5226_v59 = vld [vmem:[%s6965_s7 + $0x37c] ss:$12 sps:$4 sm:$0xff]   ;;  %v5227_v17 = vld [vmem:[%s6965_s7 + $0x5c0] ss:$12 sps:$4 sm:$0xff]   ;;  %v5224_v52 = vld [vmem:[%s6965_s7 + $0x378] ss:$12 sps:$4 sm:$0xff]  }
 0x3f9   : > { %3868 = vmatmul.mubr.bf16.vlgmr.msra.gmra.mrb[24].mxu0 %v6496_v33  ;;  %3689 = vmatpush1.bf16.msra.mxu1 %v5159_v21  ;;  %v5228_v21 = vld [vmem:[%s6965_s7 + $0x500] ss:$12 sps:$4 sm:$0xff]  }
 0x3fa   : > { %4801 = vmatpush3.bf16.msra.mxu0 %v5163_v32  ;;  %3690 = vmatprep.subr.bf16.mxu1 %v5166_v15  ;;  %v5231_v32 = vld [vmem:[%s6965_s7 + $0x394] ss:$12 sps:$4 sm:$0xff]   ;;  %v5232_v15 = vld [vmem:[%s6965_s7 + $0x5d8] ss:$12 sps:$4 sm:$0xff]  }
 0x3fb   : > { %4802 = vmatprep.subr.bf16.mxu0 %v5167_v34  ;;  %v5233_v34 = vld [vmem:[%s6965_s7 + $0x518] ss:$12 sps:$4 sm:$0xff]  }
 0x3fd   : > { %3691 = vmatpush1.bf16.msra.mxu1 %v5164_v36  ;;  %v5236_v36 = vld [vmem:[%s6965_s7 + $0x3ac] ss:$12 sps:$4 sm:$0xff]  }
 0x3fe   : > { %4803 = vmatpush3.bf16.msra.mxu0 %v5168_v38  ;;  %3692 = vmatprep.subr.bf16.mxu1 %v5171_v39  ;;  %v5237_v38 = vld [vmem:[%s6965_s7 + $0x5f0] ss:$12 sps:$4 sm:$0xff]   ;;  %v5234_v39 = vld [vmem:[%s6965_s7 + $0x3a8] ss:$12 sps:$4 sm:$0xff]  }
 0x3ff   : > { %4804 = vmatprep.subr.bf16.mxu0 %v5172_v40  ;;  %v5238_v40 = vld [vmem:[%s6965_s7 + $0x530] ss:$12 sps:$4 sm:$0xff]  }
 0x401   : > { %3693 = vmatpush1.bf16.msra.mxu1 %v5169_v26  ;;  %v5241_v26 = vld [vmem:[%s6965_s7 + $0x3c4] ss:$12 sps:$4 sm:$0xff]  }
 0x402   : > { %4805 = vmatpush3.bf16.msra.mxu0 %v5173_v41  ;;  %3694 = vmatprep.subr.bf16.mxu1 %v5176_v43  ;;  %v5239_v41 = vld [vmem:[%s6965_s7 + $0x3c0] ss:$12 sps:$4 sm:$0xff]   ;;  %v5244_v43 = vld [vmem:[%s6965_s7 + $0x3dc] ss:$12 sps:$4 sm:$0xff]  }
 0x403   : > { %4806 = vmatprep.subr.bf16.mxu0 %v5177_v44  ;;  %v6696_v44 = vpack.c.bf16 %v6385_v31, %v6385_v31  ;;  %v5250_v31 = vld [vmem:[%s6965_s7 + $0x40c] ss:$12 sps:$4 sm:$0xff]  }
 0x405   : > { %3695 = vmatpush1.bf16.msra.mxu1 %v5174_v45  ;;  %v5242_v45 = vld [vmem:[%s6965_s7 + $0x3d8] ss:$12 sps:$4 sm:$0xff]  }
 0x406   : > { %4807 = vmatpush3.bf16.msra.mxu0 %v5178_v35  ;;  %3696 = vmatprep.subr.bf16.mxu1 %v5181_v19  ;;  %v5247_v35 = vld [vmem:[%s6965_s7 + $0x3f4] ss:$12 sps:$4 sm:$0xff]   ;;  %v5245_v19 = vld [vmem:[%s6965_s7 + $0x3f0] ss:$12 sps:$4 sm:$0xff]  }
 0x407   : > { %4808 = vmatprep.subr.bf16.mxu0 %v5182_v48  ;;  %v5248_v48 = vld [vmem:[%s6965_s7 + $0x408] ss:$12 sps:$4 sm:$0xff]  }
 0x409   : > { %3697 = vmatpush1.bf16.msra.mxu1 %v5179_v50  ;;  %v5253_v50 = vld [vmem:[%s6965_s7 + $0x424] ss:$12 sps:$4 sm:$0xff]  }
 0x40a   : > { %4809 = vmatpush3.bf16.msra.mxu0 %v5183_v55  ;;  %3698 = vmatprep.subr.bf16.mxu1 %v5186_v37  ;;  %v5251_v55 = vld [vmem:[%s6965_s7 + $0x420] ss:$12 sps:$4 sm:$0xff]   ;;  %v5256_v37 = vld [vmem:[%s6965_s7 + $0x43c] ss:$12 sps:$4 sm:$0xff]  }
 0x40b   : > { %v2270_v0 = vpop.f32.mrb[8].mxu0  ;;  %4810 = vmatprep.subr.bf16.mxu0 %v5187_v28  ;;  %v5254_v28 = vld [vmem:[%s6965_s7 + $0x438] ss:$12 sps:$4 sm:$0xff]  }
 0x40c   : > { %v2272_v58 = vpop.f32.mrb[9].mxu0  ;;  %v6592_v7 = vpack.c.bf16 %v2270_v0, %v2270_v0  ;;  %v5260_v0 = vld [vmem:[%s6965_s7 + $0x468] ss:$12 sps:$4 sm:$0xff]  }
 0x40d   : > { %v2331_v61 = vpack.c.bf16 %v2272_v58, %v2272_v58  ;;  %v2274_v60 = vpop.f32.mrb[10].mxu0  ;;  %3699 = vmatpush1.bf16.msra.mxu1 %v5184_v51  ;;  %v5259_v51 = vld [vmem:[%s6965_s7 + $0x454] ss:$12 sps:$4 sm:$0xff]  }
 0x40e   : > { %4811 = vmatpush3.bf16.msra.mxu0 %v5188_v42  ;;  %v2275_v29 = vpop.f32.mrb[11].mxu0  ;;  %3700 = vmatprep.subr.bf16.mxu1 %v5191_v53  ;;  %v5257_v42 = vld [vmem:[%s6965_s7 + $0x450] ss:$12 sps:$4 sm:$0xff]   ;;  %v5262_v53 = vld [vmem:[%s6965_s7 + $0x46c] ss:$12 sps:$4 sm:$0xff]  }
 0x40f   : > { %3907 = vmatprep.mubr.bf16.mxu0 %v2331_v61  ;;  %4812 = vmatprep.subr.bf16.mxu0 %v5192_v57  ;;  %v5265_v57 = vld [vmem:[%s6965_s7 + $0x484] ss:$12 sps:$4 sm:$0xff]   ;;  %v5263_v58 = vld [vmem:[%s6965_s7 + $0x480] ss:$12 sps:$4 sm:$0xff]  }
 0x410   : > { %v5266_v60 = vld [vmem:[%s6965_s7 + $0x498] ss:$12 sps:$4 sm:$0xff]   ;;  %v5269_v29 = vld [vmem:[%s6965_s7 + $0x4b0] ss:$12 sps:$4 sm:$0xff]  }
 0x411   : > { %3701 = vmatpush1.bf16.msra.mxu1 %v5189_v47  ;;  %v5271_v47 = vld [vmem:[%s6965_s7 + $0x4b4] ss:$12 sps:$4 sm:$0xff]  }
 0x412   : > { %4813 = vmatpush3.bf16.msra.mxu0 %v5193_v62  ;;  %3702 = vmatprep.subr.bf16.mxu1 %v5196_v63  ;;  %v5274_v62 = vld [vmem:[%s6965_s7 + $0x4cc] ss:$12 sps:$4 sm:$0xff]   ;;  %v5272_v63 = vld [vmem:[%s6965_s7 + $0x4c8] ss:$12 sps:$4 sm:$0xff]  }
 0x413   : > { %4814 = vmatprep.subr.bf16.mxu0 %v5197_v56  ;;  %v5277_v56 = vld [vmem:[%s6965_s7 + $0x4e4] ss:$12 sps:$4 sm:$0xff]  }
 0x415   : > { %3703 = vmatpush1.bf16.msra.mxu1 %v5194_v54  ;;  %v5275_v54 = vld [vmem:[%s6965_s7 + $0x4e0] ss:$12 sps:$4 sm:$0xff]  }
 0x416   : > { %4815 = vmatpush3.bf16.msra.mxu0 %v5198_v2  ;;  %3713 = vmatprep.subr.bf16.mxu1 %v5201_v3  ;;  %v5280_v2 = vld [vmem:[%s6965_s7 + $0x4fc] ss:$12 sps:$4 sm:$0xff]   ;;  %v5278_v3 = vld [vmem:[%s6965_s7 + $0x4f8] ss:$12 sps:$4 sm:$0xff]  }
 0x417   : > { %4822 = vmatprep.subr.bf16.mxu0 %v5202_v13  ;;  %v5283_v13 = vld [vmem:[%s6965_s7 + $0x514] ss:$12 sps:$4 sm:$0xff]  }
 0x418   : > { %3705 = vmatmul.mubr.bf16.vlgmr.msra.gmra.mrb[8].mxu1 %v6496_v33  ;;  %v5229_v33 = vld [vmem:[%s6965_s7 + $0x390] ss:$12 sps:$4 sm:$0xff]  }
 0x419   : > { %3908 = vmatmul.mubr.bf16.vlgmr.msra.gmra.mrb[28].mxu0 %v6592_v7  ;;  %3714 = vmatpush1.bf16.msra.mxu1 %v5199_v5  ;;  %v5281_v5 = vld [vmem:[%s6965_s7 + $0x510] ss:$12 sps:$4 sm:$0xff]  }
 0x41a   : > { %3745 = vmatprep.mubr.bf16.mxu1 %v2331_v61  ;;  %4823 = vmatpush3.bf16.msra.mxu0 %v5203_v6  ;;  %v5268_v61 = vld [vmem:[%s6965_s7 + $0x49c] ss:$12 sps:$4 sm:$0xff]   ;;  %v5286_v6 = vld [vmem:[%s6965_s7 + $0x52c] ss:$12 sps:$4 sm:$0xff]  }
 0x41b   : > { %3947 = vmatprep.mubr.bf16.mxu0 %v6603_v10  ;;  %3715 = vmatprep.subr.bf16.mxu1 %v5206_v8  ;;  %v5289_v8 = vld [vmem:[%s6965_s7 + $0x544] ss:$12 sps:$4 sm:$0xff]  }
 0x41c   : > { %4824 = vmatprep.subr.bf16.mxu0 %v5207_v9  ;;  %v5287_v9 = vld [vmem:[%s6965_s7 + $0x540] ss:$12 sps:$4 sm:$0xff]  }
 0x41d   : > { %3716 = vmatpush1.bf16.msra.mxu1 %v5204_v11  ;;  %v5290_v11 = vld [vmem:[%s6965_s7 + $0x558] ss:$12 sps:$4 sm:$0xff]  }
 0x41e   : > { %4825 = vmatpush3.bf16.msra.mxu0 %v5208_v1  ;;  %3717 = vmatprep.subr.bf16.mxu1 %v5211_v12  ;;  %v5295_v1 = vld [vmem:[%s6965_s7 + $0x574] ss:$12 sps:$4 sm:$0xff]   ;;  %v5293_v12 = vld [vmem:[%s6965_s7 + $0x570] ss:$12 sps:$4 sm:$0xff]  }
 0x41f   : > { %4826 = vmatprep.subr.bf16.mxu0 %v5212_v46  ;;  %v5298_v46 = vld [vmem:[%s6965_s7 + $0x58c] ss:$12 sps:$4 sm:$0xff]  }
 0x421   : > { %3718 = vmatpush1.bf16.msra.mxu1 %v5209_v4  ;;  %v5296_v4 = vld [vmem:[%s6965_s7 + $0x588] ss:$12 sps:$4 sm:$0xff]  }
 0x422   : > { %4827 = vmatpush3.bf16.msra.mxu0 %v5213_v16  ;;  %3719 = vmatprep.subr.bf16.mxu1 %v5216_v20  ;;  %v5301_v16 = vld [vmem:[%s6965_s7 + $0x5a4] ss:$12 sps:$4 sm:$0xff]   ;;  %v5299_v20 = vld [vmem:[%s6965_s7 + $0x5a0] ss:$12 sps:$4 sm:$0xff]  }
 0x423   : > { %4828 = vmatprep.subr.bf16.mxu0 %v5217_v14  ;;  %v5304_v14 = vld [vmem:[%s6965_s7 + $0x5bc] ss:$12 sps:$4 sm:$0xff]  }
 0x425   : > { %3720 = vmatpush1.bf16.msra.mxu1 %v5214_v22  ;;  %v5302_v22 = vld [vmem:[%s6965_s7 + $0x5b8] ss:$12 sps:$4 sm:$0xff]  }
 0x426   : > { %4829 = vmatpush3.bf16.msra.mxu0 %v5218_v23  ;;  %3721 = vmatprep.subr.bf16.mxu1 %v5221_v24  ;;  %v5307_v23 = vld [vmem:[%s6965_s7 + $0x5d4] ss:$12 sps:$4 sm:$0xff]   ;;  %v5305_v24 = vld [vmem:[%s6965_s7 + $0x5d0] ss:$12 sps:$4 sm:$0xff]  }
 0x427   : > { %4830 = vmatprep.subr.bf16.mxu0 %v5222_v25  ;;  %v5310_v25 = vld [vmem:[%s6965_s7 + $0x5ec] ss:$12 sps:$4 sm:$0xff]  }
 0x429   : > { %3722 = vmatpush1.bf16.msra.mxu1 %v5219_v27  ;;  %v5308_v27 = vld [vmem:[%s6965_s7 + $0x5e8] ss:$12 sps:$4 sm:$0xff]  }
 0x42a   : > { %4831 = vmatpush3.bf16.msra.mxu0 %v5223_v30  ;;  %3723 = vmatprep.subr.bf16.mxu1 %v5226_v59  ;;  %v5311_v30 = vld [vmem:[%s6967_s9 + $0x40] sm:$0xff]  }
 0x42b   : > { %4832 = vmatprep.subr.bf16.mxu0 %v5227_v17  ;;  %v5312_v59 = vld [vmem:[%s6967_s9] sm:$0xff]   ;;  %v5313_v17 = vld [vmem:[%s6967_s9 + $0x48] sm:$0xff]  }
 0x42d   : > { %3724 = vmatpush1.bf16.msra.mxu1 %v5224_v52  ;;  %v5314_v52 = vld [vmem:[%s6967_s9 + $0x8] sm:$0xff]  }
 0x42e   : > { %4833 = vmatpush3.bf16.msra.mxu0 %v5228_v21  ;;  %3725 = vmatprep.subr.bf16.mxu1 %v5231_v32  ;;  %v5315_v21 = vld [vmem:[%s6967_s9 + $0x50] sm:$0xff]  }
 0x42f   : > { %4834 = vmatprep.subr.bf16.mxu0 %v5232_v15  ;;  %v5316_v32 = vld [vmem:[%s6967_s9 + $0x10] sm:$0xff]   ;;  %v5317_v15 = vld [vmem:[%s6967_s9 + $0x58] sm:$0xff]  }
 0x431   : > { %3726 = vmatpush1.bf16.msra.mxu1 %v5229_v33  ;;  %v5318_v33 = vld [vmem:[%s6967_s9 + $0x18] sm:$0xff]  }
 0x432   : > { %4835 = vmatpush3.bf16.msra.mxu0 %v5233_v34  ;;  %3727 = vmatprep.subr.bf16.mxu1 %v5236_v36  ;;  %v5319_v34 = vld [vmem:[%s6967_s9 + $0x60] sm:$0xff]  }
 0x433   : > { %4836 = vmatprep.subr.bf16.mxu0 %v5237_v38  ;;  %v5320_v36 = vld [vmem:[%s6967_s9 + $0x20] sm:$0xff]   ;;  %v5321_v38 = vld [vmem:[%s6967_s9 + $0x68] sm:$0xff]  }
 0x435   : > { %3728 = vmatpush1.bf16.msra.mxu1 %v5234_v39  ;;  %v5322_v39 = vld [vmem:[%s6967_s9 + $0x28] sm:$0xff]  }
 0x436   : > { %4837 = vmatpush3.bf16.msra.mxu0 %v5238_v40  ;;  %3729 = vmatprep.subr.bf16.mxu1 %v5241_v26 }
 0x437   : > { %4844 = vmatprep.subr.bf16.mxu0 %v5311_v30 }
 0x439   : > { %3948 = vmatmul.mubr.bf16.vlgmr.msra.gmra.mrb[32].mxu0 %v6696_v44  ;;  %3730 = vmatpush1.bf16.msra.mxu1 %v5239_v41 }
 0x43a   : > { %3731 = vmatprep.subr.bf16.mxu1 %v5244_v43  ;;  %4845 = vmatpush3.bf16.msra.mxu0 %v5312_v59 }
 0x43b   : > { %4846 = vmatprep.subr.bf16.mxu0 %v5313_v17 }
 0x43d   : > { %3732 = vmatpush1.bf16.msra.mxu1 %v5242_v45  ;;  %v6874_v45 = vshrl.u32 %v483_v49, 7 }
 0x43e   : > { %3733 = vmatprep.subr.bf16.mxu1 %v5247_v35  ;;  %4847 = vmatpush3.bf16.msra.mxu0 %v5314_v52 }
 0x43f   : > { %4848 = vmatprep.subr.bf16.mxu0 %v5315_v21  ;;  %v3626_v35 = vsub.s32 2, %v6874_v45 }
 0x441   : > { %3734 = vmatpush1.bf16.msra.mxu1 %v5245_v19  ;;  %v2590_v19 = vld [vmem:[%s6966_s8] sm:$0x7] }
 0x442   : > { %3735 = vmatprep.subr.bf16.mxu1 %v5250_v31  ;;  %4849 = vmatpush3.bf16.msra.mxu0 %v5316_v32  ;;  %v3627_v31 = vrot.slane %v2590_v19, %v3626_v35 }
 0x443   : > { %4850 = vmatprep.subr.bf16.mxu0 %v5317_v15  ;;  %v3999_v15 = vld [vmem:[%s6968_s10] sm:$0x1] }
 0x445   : > { %3736 = vmatpush1.bf16.msra.mxu1 %v5248_v48 }
 0x446   : > { %3737 = vmatprep.subr.bf16.mxu1 %v5253_v50  ;;  %4851 = vmatpush3.bf16.msra.mxu0 %v5318_v33 }
 0x447   : > { %4852 = vmatprep.subr.bf16.mxu0 %v5319_v34 }
 0x449   : > { %3738 = vmatpush1.bf16.msra.mxu1 %v5251_v55 }
 0x44a   : > { %3739 = vmatprep.subr.bf16.mxu1 %v5256_v37  ;;  %4853 = vmatpush3.bf16.msra.mxu0 %v5320_v36 }
 0x44b   : > { %4854 = vmatprep.subr.bf16.mxu0 %v5321_v38 }
 0x44d   : > { %3740 = vmatpush1.bf16.msra.mxu1 %v5254_v28 }
 0x44e   : > { %3741 = vmatprep.subr.bf16.mxu1 %v5259_v51  ;;  %4855 = vmatpush3.bf16.msra.mxu0 %v5322_v39 }
 0x451   : > { %3742 = vmatpush1.bf16.msra.mxu1 %v5257_v42 }
 0x452   : > { %3743 = vmatprep.subr.bf16.mxu1 %v5262_v53  ;;  %v5323_v53 = vld [vmem:[%s6967_s9 + $0x70] sm:$0xff]  }
 0x453   : > { %4856 = vmatprep.subr.bf16.mxu0 %v5323_v53 }
 0x455   : > { %3744 = vmatpush1.bf16.msra.mxu1 %v5260_v0  ;;  %v5324_v0 = vld [vmem:[%s6967_s9 + $0x30] sm:$0xff]  }
 0x456   : > { %3754 = vmatprep.subr.bf16.mxu1 %v5265_v57  ;;  %4857 = vmatpush3.bf16.msra.mxu0 %v5324_v0 }
 0x458   : > { %3746 = vmatmul.mubr.bf16.vlgmr.msra.gmra.mrb[8].mxu1 %v6592_v7  ;;  %v5284_v7 = vld [vmem:[%s6965_s7 + $0x528] ss:$12 sps:$4 sm:$0xff]  }
 0x459   : > { %3755 = vmatpush1.bf16.msra.mxu1 %v5263_v58  ;;  %3786 = vmatprep.mubr.bf16.mxu1 %v6603_v10  ;;  %v5292_v10 = vld [vmem:[%s6965_s7 + $0x55c] ss:$12 sps:$4 sm:$0xff]  }
 0x45a   : > { %3756 = vmatprep.subr.bf16.mxu1 %v5268_v61 }
 0x45d   : > { %3757 = vmatpush1.bf16.msra.mxu1 %v5266_v60 }
 0x45e   : > { %3758 = vmatprep.subr.bf16.mxu1 %v5271_v47  ;;  %v5325_v47 = vld [vmem:[%s6967_s9 + $0x78] sm:$0xff]  }
 0x45f   : > { %4858 = vmatprep.subr.bf16.mxu0 %v5325_v47 }
 0x461   : > { %3759 = vmatpush1.bf16.msra.mxu1 %v5269_v29 }
 0x462   : > { %3760 = vmatprep.subr.bf16.mxu1 %v5274_v62  ;;  %v5326_v62 = vld [vmem:[%s6967_s9 + $0x38] sm:$0xff]  }
 0x463   : > { %4859 = vmatpush3.bf16.msra.mxu0 %v5326_v62 }
 0x464   : > { %4891 = vmatprep.subr.bf16.mxu0 %v5410_v18 }
 0x465   : > { %3761 = vmatpush1.bf16.msra.mxu1 %v5272_v63 }
 0x466   : > { %3762 = vmatprep.subr.bf16.mxu1 %v5277_v56 }
 0x469   : > { %3763 = vmatpush1.bf16.msra.mxu1 %v5275_v54 }
 0x46a   : > { %3764 = vmatprep.subr.bf16.mxu1 %v5280_v2 }
 0x46d   : > { %3765 = vmatpush1.bf16.msra.mxu1 %v5278_v3 }
 0x46e   : > { %3766 = vmatprep.subr.bf16.mxu1 %v5283_v13 }
 0x471   : > { %3767 = vmatpush1.bf16.msra.mxu1 %v5281_v5  ;;  %v3618_v5 = vsub.s32 0, %v6874_v45 }
 0x472   : > { %3768 = vmatprep.subr.bf16.mxu1 %v5286_v6  ;;  %v3622_v6 = vsub.s32 1, %v6874_v45 }
 0x475   : > { %3769 = vmatpush1.bf16.msra.mxu1 %v5284_v7  ;;  %v3619_v7 = vrot.slane %v2590_v19, %v3618_v5 }
 0x476   : > { %3770 = vmatprep.subr.bf16.mxu1 %v5289_v8  ;;  %v3623_v8 = vrot.slane %v2590_v19, %v3622_v6 }
 0x479   : > { %3771 = vmatpush1.bf16.msra.mxu1 %v5287_v9 }
 0x47a   : > { %3772 = vmatprep.subr.bf16.mxu1 %v5292_v10 }
 0x47d   : > { %3773 = vmatpush1.bf16.msra.mxu1 %v5290_v11 }
 0x47e   : > { %3774 = vmatprep.subr.bf16.mxu1 %v5295_v1 }
 0x481   : > { %3775 = vmatpush1.bf16.msra.mxu1 %v5293_v12 }
 0x482   : > { %3776 = vmatprep.subr.bf16.mxu1 %v5298_v46 }
 0x485   : > { %3777 = vmatpush1.bf16.msra.mxu1 %v5296_v4 }
 0x486   : > { %3778 = vmatprep.subr.bf16.mxu1 %v5301_v16 }
 0x489   : > { %3779 = vmatpush1.bf16.msra.mxu1 %v5299_v20 }
 0x48a   : > { %3780 = vmatprep.subr.bf16.mxu1 %v5304_v14  ;;  %v5327_v14 = vld [vmem:[%s6967_s9 + $0x80] sm:$0xff]  }
 0x48d   : > { %3781 = vmatpush1.bf16.msra.mxu1 %v5302_v22 }
 0x48e   : > { %3782 = vmatprep.subr.bf16.mxu1 %v5307_v23  ;;  %v5328_v23 = vld [vmem:[%s6967_s9 + $0x88] sm:$0xff]  }
 0x491   : > { %3783 = vmatpush1.bf16.msra.mxu1 %v5305_v24  ;;  %v5329_v24 = vld [vmem:[%s6967_s9 + $0x90] sm:$0x3f]  }
 0x492   : > { %3784 = vmatprep.subr.bf16.mxu1 %v5310_v25 }
 0x495   : > { %3785 = vmatpush1.bf16.msra.mxu1 %v5308_v27  ;;  %v4119_v27 = vsel %vm4117_vm12, %v5329_v24, 0 }
 0x498   : > { %3787 = vmatmul.mubr.bf16.vlgmr.msra.gmra.mrb[8].mxu1 %v6696_v44 }
 0x4ab   : > { %v4772_v40 = vpop.f32.mrb[20].mxu0 }
 0x4ac   : > { %v4773_v26 = vpop.f32.mrb[21].mxu0 }
 0x4ad   : > { %v4774_v41 = vadd.f32 %v4773_v26, %v4772_v40  ;;  %v4775_v43 = vpop.f32.mrb[22].mxu0 }
 0x4ae   : > { %v4776_v44 = vpop.f32.mrb[23].mxu0 }
 0x4af   : > { %v3830_v55 = vadd.f32 %v4774_v41, %v3627_v31 }
 0x4cc   : > { %v4794_v48 = vpop.f32.mrb[24].mxu0 }
 0x4cd   : > { %v4795_v50 = vpop.f32.mrb[25].mxu0 }
 0x4ce   : > { %v4796_v37 = vadd.f32 %v4795_v50, %v4794_v48  ;;  %v4797_v28 = vpop.f32.mrb[26].mxu0 }
 0x4cf   : > { %v4798_v51 = vpop.f32.mrb[27].mxu0 }
 0x4d0   : > { %v3870_v42 = vadd.f32 %v4796_v37, %v3830_v55 }
 0x4ec   : > { %v4816_v49 = vpop.f32.mrb[28].mxu0 }
 0x4ed   : > { %v4817_v57 = vpop.f32.mrb[29].mxu0 }
 0x4ee   : > { %v4818_v58 = vadd.f32 %v4817_v57, %v4816_v49  ;;  %v4819_v61 = vpop.f32.mrb[30].mxu0 }
 0x4ef   : > { %v4820_v60 = vpop.f32.mrb[31].mxu0 }
 0x4f0   : > { %v3910_v29 = vadd.f32 %v4818_v58, %v3870_v42 }
 0x50c   : > { %v4838_v63 = vpop.f32.mrb[32].mxu0 }
 0x50d   : > { %v4839_v56 = vpop.f32.mrb[33].mxu0 }
 0x50e   : > { %v4840_v54 = vadd.f32 %v4839_v56, %v4838_v63  ;;  %v4841_v2 = vpop.f32.mrb[34].mxu0 }
 0x50f   : > { %v4842_v3 = vpop.f32.mrb[35].mxu0 }
 0x510   : > { %v3950_v13 = vadd.f32 %v4840_v54, %v3910_v29 }
 0x512   : > { %v3957_v25 = vmax.f32 %v3950_v13, 0.0 }
 0x514   : > { %v3960_v30 = vpack.c.bf16 %v3957_v25, %v3957_v25 }
 0x56b   : > { %v3788_v9 = vpop.f32.mrb[8].mxu1 }
 0x56c   : > { %v4912_v10 = vadd.f32 %v3788_v9, %v3619_v7  ;;  %v3790_v11 = vpop.f32.mrb[9].mxu1 }
 0x56d   : > { %v4913_v1 = vadd.f32 %v3790_v11, %v3623_v8  ;;  %v3792_v12 = vpop.f32.mrb[10].mxu1 }
 0x56e   : > { %v3955_v46 = vmax.f32 %v4912_v10, 0.0  ;;  %v3793_v4 = vpop.f32.mrb[11].mxu1 }
 0x56f   : > { %v3956_v16 = vmax.f32 %v4913_v1, 0.0 }
 0x570   : > { %v3958_v22 = vpack.c.bf16 %v3955_v46, %v3955_v46 }
 0x571   : > { %v3959_v20 = vpack.c.bf16 %v3956_v16, %v3956_v16 }
 0x573   : > { %4153 = vmatprep.mubr.bf16.mxu0 %v3959_v20 }
 0x574   : > { %4154 = vmatmul.mubr.bf16.vlgmr.msra.gmra.mrb[36].mxu0 %v3958_v22 }
 0x575   : > { %4892 = vmatpush3.bf16.msra.mxu0 %v5327_v14  ;;  %4897 = vmatprep.mubr.msk.bf16.mxu0 %vm5409_vm1, %v5410_v18 }
 0x576   : > { %4893 = vmatprep.subr.bf16.mxu0 %v5410_v18 }
 0x579   : > { %4894 = vmatpush3.bf16.msra.mxu0 %v5328_v23 }
 0x57a   : > { %4895 = vmatprep.subr.bf16.mxu0 %v5410_v18 }
 0x57d   : > { %4896 = vmatpush3.bf16.msra.mxu0 %v4119_v27 }
 0x580   : > { %4898 = vmatmul.mubr.msk.bf16.vlgmr.msra.gmra.mrb[40].mxu0 %vm4113_vm13, %v3960_v30 }
 0x647   : > { %v4860_v59 = vpop.f32.mrb[36].mxu0 }
 0x648   : > { %v4861_v17 = vpop.f32.mrb[37].mxu0 }
 0x649   : > { %v4862_v52 = vadd.f32 %v4861_v17, %v4860_v59  ;;  %v4863_v21 = vpop.f32.mrb[38].mxu0 }
 0x64a   : > { %v4864_v32 = vpop.f32.mrb[39].mxu0 }
 0x64b   : > { %v4156_v33 = vadd.f32 %v4862_v52, %v3999_v15 }
 0x653   : > { %v4195_v18 = vpop.f32.mrb[40].mxu0 }
 0x654   : > { %v4196_v34 = vadd.f32 %v4195_v18, %v4156_v33  ;;  %v4899_v36 = vpop.f32.mrb[41].mxu0 }
 0x655   : > { %v4198_v38 = vpop.f32.mrb[42].mxu0 }
 0x656   : > { %v4204_v39 = vrot.slane %v4196_v34, %v3618_v5  ;;  %v4900_v40 = vpop.f32.mrb[43].mxu0 }
 0x658   : > { %4205 = vst [vmem:[%s424_s14] sm:$0xff] %v4204_v39 }
 0x659   : > { %5349 = shalt.err (!%p5346_p3)
}
 0x65a   : > { %s5350_s24 = scalar_lea.hbm %s6916_s22, 128  ;;  %s5354_s15 = scalar_lea.hbm %s6969_s11, 256 }
 0x65b   : > { %p5351_p4 = scmp.ne.s32.totalorder %s6916_s22, %s5350_s24  ;;  %p5355_p9 = scmp.lt.u32.totalorder %s6916_s22, %s6969_s11 }
 0x65c   : > { %p5356_p10 = scmp.lt.u32.totalorder %s5354_s15, %s5350_s24  ;;  %p5358_p12 = scmp.lt.u32.totalorder %s5350_s24, %s6916_s22 }
 0x65d   : > { %p5352_p7 = pnand %p5351_p4, %p5510_p5 }
 0x65e   : > { %p5357_p11 = por %p5356_p10, %p5355_p9 }
 0x65f   : > { %p5353_p8 = pneg %p5352_p7 }
 0x660   : > { %p5359_p13 = por %p5358_p12, %p5357_p11 }
 0x662   : > { %p5360_p0 = pnand %p5359_p13, %p5353_p8 }
 0x664   : > { %5363 = shalt.err (!%p5360_p0)
}
 0x665   : > { %4954 = dma.vmem_to_hbm [thread:$0]  (%p5510_p5), %s6918_s30, 128, %s6916_s22, %s4207_s29  }
 0x666 PF: > { %p4960_p1 = scmp.ge.s32.totalorder %s5398_s20, 2  ;;  %s4232_s0 = sand.u32 1, %s5386_s17  }
 0x667   : > { %s4233_s21 = scalar_lea.sflag [#allocation3], %s4232_s0 }
 0x668   : > { %p4957_p2 = pnand %p4960_p1, %p5514_p6 }
 0x66a   : > { %5381 = dma.done.wait (!%p4957_p2), %s4233_s21, 128  }
 0x66b   : > { %5383 = vsyncadd (!%p4957_p2), %s4233_s21, 4294967168  ;;  %p21_p3 = scmp.ge.s32.totalorder %s5497_s23, 4   ;;  %s6974_s17 = smov %s5390_s18 }
 0x66c   : > { %s6975_s18 = smov %s5394_s19  ;;  %s6976_s19 = smov %s5508_s26 }
 0x66d   : > { %s6977_s20 = smov %s5497_s23  ;;  %23 = sbr.rel (!%p21_p3) target bundleno = 5 (0x5), region = 108 }
 0x674   :  { %4238 = vsyncpa [#allocation3], 1 }
 0x675   :  { %4240 = vsyncpa [#allocation3 + $0x1], 1 }

</bundles_post_ra>
